<compile_context>
chip_gen: v7x
topology: tpu7x:2x2x1
jax: 0.10.0
libtpu: 0.0.40
codegen_flags: <defaults>
</compile_context>

<pallas_src>
import functools
import math

import jax
import jax.numpy as jnp
from jax.experimental import pallas as pl
from jax.experimental.pallas import tpu as pltpu


# ---------------------------------------------------------------------------
# Fused Pallas kernel: 3 x (ModulatedConv2d 3x3, demodulate) + FusedLeakyReLU
# for one batch sample, intermediates resident in VMEM.
# ---------------------------------------------------------------------------
def _refiner_convs_kernel(x_ref,
                          w1_ref, w2_ref, w3_ref,
                          s1_ref, s2_ref, s3_ref,
                          d1_ref, d2_ref, d3_ref,
                          b1_ref, b2_ref, b3_ref,
                          o_ref,
                          pad_ref, *, H, W):
    """
    x_ref  : (1, H, W, 12)     DWT-split activations (NHWC) for this sample
    w*_ref : (9*Cin, Cout)     bf16 base weight * 1/sqrt(9*Cin), rows (ky,kx,ci)
    s*_ref : (1, 1, Cin)       per-sample style modulation (scales input chans)
    d*_ref : (1, 1, Cout)      per-sample demodulation (scales output chans)
    b*_ref : (1, Cout)         FusedLeakyReLU bias
    o_ref  : (1, H, W, 12)
    pad_ref: (H+2, W+2, Cmax)  VMEM scratch holding the zero halo for all convs
    """
    gain = math.sqrt(2.0)

    # Halo stays zero for the whole kernel; only the interior is rewritten.
    pad_ref[...] = jnp.zeros_like(pad_ref)

    def styled_conv(x_hwc, w_ref, s_ref, d_ref, b_ref):
        cin = x_hwc.shape[-1]
        cout = w_ref.shape[-1]
        # Modulate input channels (mathematically identical to modulating the
        # weights, since the conv is linear).
        xm = x_hwc * s_ref[0]
        # Zero-padded halo in VMEM scratch (padding = 1).
        pad_ref[1:H + 1, 1:W + 1, :cin] = xm
        # im2col: one (H*W, 9*Cin) @ (9*Cin, Cout) MXU matmul, bf16 in, f32 acc.
        cols = [pad_ref[ky:ky + H, kx:kx + W, :cin].reshape(H * W, cin)
                for ky in range(3) for kx in range(3)]
        patches = jnp.concatenate(cols, axis=-1).astype(jnp.bfloat16)
        acc = jnp.dot(patches, w_ref[...], preferred_element_type=jnp.float32)
        # Demodulate (folded onto output channels), bias, FusedLeakyReLU.
        # TODO(synk): NoiseInjection skipped — its weight is 0 at init, so it
        # is an exact no-op here; trained checkpoints would need it.
        out = acc * d_ref[0] + b_ref[...]
        out = jnp.where(out >= 0.0, out, 0.2 * out) * gain
        return out.reshape(H, W, cout)

    y = x_ref[0]                                           # (H, W, 12)
    y = styled_conv(y, w1_ref, s1_ref, d1_ref, b1_ref)
    y = styled_conv(y, w2_ref, s2_ref, d2_ref, b2_ref)
    y = styled_conv(y, w3_ref, s3_ref, d3_ref, b3_ref)
    o_ref[0] = y.astype(o_ref.dtype)


def _prep_layer(p, style):
    """Per-layer, per-sample parameters: base weight (bf16), style, demod, bias."""
    cout, cin, _, _ = p["weight"].shape
    style_dim = p["mod_w"].shape[1]
    # EqualLinear modulation: per-sample, per-input-channel scale.
    s = style @ p["mod_w"].T * (1.0 / math.sqrt(style_dim)) + p["mod_b"][None, :]
    scale = 1.0 / math.sqrt(cin * 9)
    # (Cout, Cin, ky, kx) -> (ky, kx, Cin, Cout); rows ordered (ky, kx, ci).
    w = jnp.transpose(p["weight"], (2, 3, 1, 0)) * scale           # (3,3,Cin,Cout)
    w_mat = w.reshape(9 * cin, cout).astype(jnp.bfloat16)
    # demod[b, cout] = rsqrt(sum_{cin,k} (scale*W*s)^2 + eps)
    sq_w = jnp.sum(w * w, axis=(0, 1))                             # (Cin, Cout)
    demod = jax.lax.rsqrt((s * s) @ sq_w + 1e-8)                   # (B, Cout)
    return w_mat, s[:, None, :], demod[:, None, :], p["act_bias"]


def refiner_convs(params, y_nhwc, style):
    B, H, W, cin0 = y_nhwc.shape
    (w1, s1, d1, b1), (w2, s2, d2, b2), (w3, s3, d3, b3) = [
        _prep_layer(p, style) for p in params]
    cmax = max(cin0, w1.shape[1], w2.shape[1])
    cout_last = w3.shape[1]
    kern = functools.partial(_refiner_convs_kernel, H=H, W=W)
    return pl.pallas_call(
        kern,
        out_shape=jax.ShapeDtypeStruct((B, H, W, cout_last), jnp.float32),
        grid=(B,),
        in_specs=[
            pl.BlockSpec((1, H, W, cin0), lambda b: (b, 0, 0, 0)),
            pl.BlockSpec(w1.shape, lambda b: (0, 0)),
            pl.BlockSpec(w2.shape, lambda b: (0, 0)),
            pl.BlockSpec(w3.shape, lambda b: (0, 0)),
            pl.BlockSpec((1,) + s1.shape[1:], lambda b: (b, 0, 0)),
            pl.BlockSpec((1,) + s2.shape[1:], lambda b: (b, 0, 0)),
            pl.BlockSpec((1,) + s3.shape[1:], lambda b: (b, 0, 0)),
            pl.BlockSpec((1,) + d1.shape[1:], lambda b: (b, 0, 0)),
            pl.BlockSpec((1,) + d2.shape[1:], lambda b: (b, 0, 0)),
            pl.BlockSpec((1,) + d3.shape[1:], lambda b: (b, 0, 0)),
            pl.BlockSpec(b1.shape, lambda b: (0, 0)),
            pl.BlockSpec(b2.shape, lambda b: (0, 0)),
            pl.BlockSpec(b3.shape, lambda b: (0, 0)),
        ],
        out_specs=pl.BlockSpec((1, H, W, cout_last), lambda b: (b, 0, 0, 0)),
        scratch_shapes=[pltpu.VMEM((H + 2, W + 2, cmax), jnp.float32)],
        compiler_params=pltpu.CompilerParams(
            dimension_semantics=("parallel",)),
    )(y_nhwc, w1, w2, w3, s1, s2, s3, d1, d2, d3, b1, b2, b3)


# ---------------------------------------------------------------------------
# Haar (db1) DWT forward / inverse, J=1, mode='zero' (pure data rearrangement)
# ---------------------------------------------------------------------------
def dwt_split(x):
    """x: (B, 3, H, W) NCHW -> (B, 12, H/2, W/2) = cat([LL, fine.view(B,9,...)])."""
    a = x[:, :, 0::2, 0::2]
    b = x[:, :, 0::2, 1::2]
    c = x[:, :, 1::2, 0::2]
    d = x[:, :, 1::2, 1::2]
    ll = (a + b + c + d) * 0.5
    b1 = (a + b - c - d) * 0.5
    b2 = (a - b + c - d) * 0.5
    b3 = (a - b - c + d) * 0.5
    B, C, m, n = ll.shape
    fine = jnp.stack([b1, b2, b3], axis=2).reshape(B, C * 3, m, n)
    return jnp.concatenate([ll, fine], axis=1)


def dwt_join(y):
    """y: (B, 12, m, n) -> (B, 3, 2m, 2n) exact Haar inverse of dwt_split."""
    B, _, m, n = y.shape
    ll = y[:, :3]
    fine = y[:, 3:].reshape(B, 3, 3, m, n)
    b1, b2, b3 = fine[:, :, 0], fine[:, :, 1], fine[:, :, 2]
    a = (ll + b1 + b2 + b3) * 0.5
    b = (ll + b1 - b2 - b3) * 0.5
    c = (ll - b1 + b2 - b3) * 0.5
    d = (ll - b1 - b2 + b3) * 0.5
    top = jnp.stack([a, b], axis=-1).reshape(B, 3, m, 2 * n)
    bot = jnp.stack([c, d], axis=-1).reshape(B, 3, m, 2 * n)
    return jnp.stack([top, bot], axis=-2).reshape(B, 3, 2 * m, 2 * n)


# ---------------------------------------------------------------------------
# Parameters (deterministic synthetic init, matches StyledConv shapes)
# ---------------------------------------------------------------------------
def init_styled_conv_params(key, cin, cout, style_dim):
    k1, k2 = jax.random.split(key)
    return {
        "weight": jax.random.normal(k1, (cout, cin, 3, 3), jnp.float32),
        "mod_w": jax.random.normal(k2, (cin, style_dim), jnp.float32),  # EqualLinear
        "mod_b": jnp.ones((cin,), jnp.float32),                          # bias_init=1
        "act_bias": jnp.zeros((1, cout), jnp.float32),                   # FusedLeakyReLU
    }


def init_refiner_params(key, channels, style_dim):
    k1, k2, k3 = jax.random.split(key, 3)
    return [
        init_styled_conv_params(k1, 12, channels, style_dim),
        init_styled_conv_params(k2, channels, channels, style_dim),
        init_styled_conv_params(k3, channels, 12, style_dim),
    ]


@jax.jit
def refiner_dwt_forward(params, x, style):
    y = dwt_split(x)                          # (B, 12, H/2, W/2) NCHW
    y = jnp.transpose(y, (0, 2, 3, 1))        # -> NHWC for the fused kernel
    y = refiner_convs(params, y, style)       # conv1 -> conv2 -> conv3, fused
    y = jnp.transpose(y, (0, 3, 1, 2))        # -> NCHW
    return dwt_join(y)                        # (B, 3, H, W)


if __name__ == "__main__":
    key = jax.random.PRNGKey(0)
    k_params, k_x, k_style = jax.random.split(key, 3)

    B, H, W = 2, 16, 16
    channels, style_dim = 16, 32

    params = init_refiner_params(k_params, channels, style_dim)
    x = jax.random.normal(k_x, (B, 3, H, W), jnp.float32)
    style = jax.random.normal(k_style, (B, style_dim), jnp.float32)

    out = refiner_dwt_forward(params, x, style)
    out = jax.block_until_ready(out)
    assert out.shape == (B, 3, H, W), out.shape
    assert jnp.all(jnp.isfinite(out))
    print("KERNEL_OK")
</pallas_src>

<mosaic_0001>
module attributes {stable_mosaic.version = 11 : i64} {
  func.func @_refiner_convs_kernel(%arg0: i32, %arg1: memref<1x8x8x12xf32, #tpu.memory_space<vmem>>, %arg2: memref<108x16xbf16, #tpu.memory_space<vmem>>, %arg3: memref<144x16xbf16, #tpu.memory_space<vmem>>, %arg4: memref<144x12xbf16, #tpu.memory_space<vmem>>, %arg5: memref<1x1x12xf32, #tpu.memory_space<vmem>>, %arg6: memref<1x1x16xf32, #tpu.memory_space<vmem>>, %arg7: memref<1x1x16xf32, #tpu.memory_space<vmem>>, %arg8: memref<1x1x16xf32, #tpu.memory_space<vmem>>, %arg9: memref<1x1x16xf32, #tpu.memory_space<vmem>>, %arg10: memref<1x1x12xf32, #tpu.memory_space<vmem>>, %arg11: memref<1x16xf32, #tpu.memory_space<vmem>>, %arg12: memref<1x16xf32, #tpu.memory_space<vmem>>, %arg13: memref<1x12xf32, #tpu.memory_space<vmem>>, %arg14: memref<1x8x8x12xf32, #tpu.memory_space<vmem>>, %arg15: memref<10x10x16xf32, #tpu.memory_space<vmem>>) attributes {dimension_semantics = [#tpu.dimension_semantics<parallel>], iteration_bounds = array<i64: 2>, scalar_prefetch = 0 : i64, scratch_operands = 1 : i64, tpu.core_type = #tpu.core_type<tc>, window_params = [{transform_indices = @transform_0, window_bounds = array<i64: 1, 8, 8, 12>}, {pipeline_mode = #tpu.pipeline_mode<synchronous>, transform_indices = @transform_1, window_bounds = array<i64: 108, 16>}, {pipeline_mode = #tpu.pipeline_mode<synchronous>, transform_indices = @transform_2, window_bounds = array<i64: 144, 16>}, {pipeline_mode = #tpu.pipeline_mode<synchronous>, transform_indices = @transform_3, window_bounds = array<i64: 144, 12>}, {transform_indices = @transform_4, window_bounds = array<i64: 1, 1, 12>}, {transform_indices = @transform_5, window_bounds = array<i64: 1, 1, 16>}, {transform_indices = @transform_6, window_bounds = array<i64: 1, 1, 16>}, {transform_indices = @transform_7, window_bounds = array<i64: 1, 1, 16>}, {transform_indices = @transform_8, window_bounds = array<i64: 1, 1, 16>}, {transform_indices = @transform_9, window_bounds = array<i64: 1, 1, 12>}, {pipeline_mode = #tpu.pipeline_mode<synchronous>, transform_indices = @transform_10, window_bounds = array<i64: 1, 16>}, {pipeline_mode = #tpu.pipeline_mode<synchronous>, transform_indices = @transform_11, window_bounds = array<i64: 1, 16>}, {pipeline_mode = #tpu.pipeline_mode<synchronous>, transform_indices = @transform_12, window_bounds = array<i64: 1, 12>}, {transform_indices = @transform_13, window_bounds = array<i64: 1, 8, 8, 12>}]} {
    %cst = arith.constant 0.000000e+00 : f32
    %0 = vector.broadcast %cst : f32 to vector<10x10x16xf32>
    %c0 = arith.constant 0 : index
    %c0_0 = arith.constant 0 : index
    %c0_1 = arith.constant 0 : index
    %1 = vector.load %arg15[%c0, %c0_0, %c0_1] : memref<10x10x16xf32, #tpu.memory_space<vmem>>, vector<10x10x16xf32>
    tpu.vector_store %arg15[%c0, %c0_0, %c0_1], %0 {strides = array<i32>} : memref<10x10x16xf32, #tpu.memory_space<vmem>>, vector<10x10x16xf32>,
    %c0_2 = arith.constant 0 : index
    %c0_3 = arith.constant 0 : index
    %c0_4 = arith.constant 0 : index
    %c0_5 = arith.constant 0 : index
    %2 = vector.load %arg1[%c0_2, %c0_3, %c0_4, %c0_5] : memref<1x8x8x12xf32, #tpu.memory_space<vmem>>, vector<1x8x8x12xf32>
    %3 = vector.shape_cast %2 : vector<1x8x8x12xf32> to vector<8x8x12xf32>
    %c0_6 = arith.constant 0 : index
    %c0_7 = arith.constant 0 : index
    %c0_8 = arith.constant 0 : index
    %4 = vector.load %arg5[%c0_6, %c0_7, %c0_8] : memref<1x1x12xf32, #tpu.memory_space<vmem>>, vector<1x1x12xf32>
    %5 = vector.shape_cast %4 : vector<1x1x12xf32> to vector<1x12xf32>
    %6 = vector.shape_cast %5 : vector<1x12xf32> to vector<1x1x12xf32>
    %7 = vector.broadcast %6 : vector<1x1x12xf32> to vector<8x8x12xf32>
    %8 = arith.mulf %3, %7 : vector<8x8x12xf32>
    %c1 = arith.constant 1 : index
    %c1_9 = arith.constant 1 : index
    %c0_10 = arith.constant 0 : index
    %9 = vector.load %arg15[%c1, %c1_9, %c0_10] : memref<10x10x16xf32, #tpu.memory_space<vmem>>, vector<8x8x12xf32>
    tpu.vector_store %arg15[%c1, %c1_9, %c0_10], %8 {strides = array<i32>} : memref<10x10x16xf32, #tpu.memory_space<vmem>>, vector<8x8x12xf32>,
    %c0_11 = arith.constant 0 : index
    %c0_12 = arith.constant 0 : index
    %c0_13 = arith.constant 0 : index
    %10 = vector.load %arg15[%c0_11, %c0_12, %c0_13] : memref<10x10x16xf32, #tpu.memory_space<vmem>>, vector<8x8x12xf32>
    %11 = vector.shape_cast %10 : vector<8x8x12xf32> to vector<64x12xf32>
    %c0_14 = arith.constant 0 : index
    %c1_15 = arith.constant 1 : index
    %c0_16 = arith.constant 0 : index
    %12 = vector.load %arg15[%c0_14, %c1_15, %c0_16] : memref<10x10x16xf32, #tpu.memory_space<vmem>>, vector<8x8x12xf32>
    %13 = vector.shape_cast %12 : vector<8x8x12xf32> to vector<64x12xf32>
    %c0_17 = arith.constant 0 : index
    %c2 = arith.constant 2 : index
    %c0_18 = arith.constant 0 : index
    %14 = vector.load %arg15[%c0_17, %c2, %c0_18] : memref<10x10x16xf32, #tpu.memory_space<vmem>>, vector<8x8x12xf32>
    %15 = vector.shape_cast %14 : vector<8x8x12xf32> to vector<64x12xf32>
    %c1_19 = arith.constant 1 : index
    %c0_20 = arith.constant 0 : index
    %c0_21 = arith.constant 0 : index
    %16 = vector.load %arg15[%c1_19, %c0_20, %c0_21] : memref<10x10x16xf32, #tpu.memory_space<vmem>>, vector<8x8x12xf32>
    %17 = vector.shape_cast %16 : vector<8x8x12xf32> to vector<64x12xf32>
    %c1_22 = arith.constant 1 : index
    %c1_23 = arith.constant 1 : index
    %c0_24 = arith.constant 0 : index
    %18 = vector.load %arg15[%c1_22, %c1_23, %c0_24] : memref<10x10x16xf32, #tpu.memory_space<vmem>>, vector<8x8x12xf32>
    %19 = vector.shape_cast %18 : vector<8x8x12xf32> to vector<64x12xf32>
    %c1_25 = arith.constant 1 : index
    %c2_26 = arith.constant 2 : index
    %c0_27 = arith.constant 0 : index
    %20 = vector.load %arg15[%c1_25, %c2_26, %c0_27] : memref<10x10x16xf32, #tpu.memory_space<vmem>>, vector<8x8x12xf32>
    %21 = vector.shape_cast %20 : vector<8x8x12xf32> to vector<64x12xf32>
    %c2_28 = arith.constant 2 : index
    %c0_29 = arith.constant 0 : index
    %c0_30 = arith.constant 0 : index
    %22 = vector.load %arg15[%c2_28, %c0_29, %c0_30] : memref<10x10x16xf32, #tpu.memory_space<vmem>>, vector<8x8x12xf32>
    %23 = vector.shape_cast %22 : vector<8x8x12xf32> to vector<64x12xf32>
    %c2_31 = arith.constant 2 : index
    %c1_32 = arith.constant 1 : index
    %c0_33 = arith.constant 0 : index
    %24 = vector.load %arg15[%c2_31, %c1_32, %c0_33] : memref<10x10x16xf32, #tpu.memory_space<vmem>>, vector<8x8x12xf32>
    %25 = vector.shape_cast %24 : vector<8x8x12xf32> to vector<64x12xf32>
    %c2_34 = arith.constant 2 : index
    %c2_35 = arith.constant 2 : index
    %c0_36 = arith.constant 0 : index
    %26 = vector.load %arg15[%c2_34, %c2_35, %c0_36] : memref<10x10x16xf32, #tpu.memory_space<vmem>>, vector<8x8x12xf32>
    %27 = vector.shape_cast %26 : vector<8x8x12xf32> to vector<64x12xf32>
    %28 = tpu.concatenate %11, %13, %15, %17, %19, %21, %23, %25, %27 in 1 : vector<64x12xf32>, vector<64x12xf32>, vector<64x12xf32>, vector<64x12xf32>, vector<64x12xf32>, vector<64x12xf32>, vector<64x12xf32>, vector<64x12xf32>, vector<64x12xf32> -> vector<64x108xf32>
    %29 = arith.truncf %28 : vector<64x108xf32> to vector<64x108xbf16>
    %c0_37 = arith.constant 0 : index
    %c0_38 = arith.constant 0 : index
    %30 = vector.load %arg2[%c0_37, %c0_38] : memref<108x16xbf16, #tpu.memory_space<vmem>>, vector<108x16xbf16>
    %cst_39 = arith.constant dense<0.000000e+00> : vector<64x16xf32>
    %31 = tpu.matmul %29, %30, %cst_39 {dimension_numbers = #tpu.dot_dimension_numbers<[1], [0], [0], [1], [0, 0, 1, 1], [], []>} : vector<64x108xbf16>, vector<108x16xbf16>, vector<64x16xf32> -> vector<64x16xf32>
    %c0_40 = arith.constant 0 : index
    %c0_41 = arith.constant 0 : index
    %c0_42 = arith.constant 0 : index
    %32 = vector.load %arg8[%c0_40, %c0_41, %c0_42] : memref<1x1x16xf32, #tpu.memory_space<vmem>>, vector<1x1x16xf32>
    %33 = vector.shape_cast %32 : vector<1x1x16xf32> to vector<1x16xf32>
    %34 = vector.broadcast %33 : vector<1x16xf32> to vector<64x16xf32>
    %35 = arith.mulf %31, %34 : vector<64x16xf32>
    %c0_43 = arith.constant 0 : index
    %c0_44 = arith.constant 0 : index
    %36 = vector.load %arg11[%c0_43, %c0_44] : memref<1x16xf32, #tpu.memory_space<vmem>>, vector<1x16xf32>
    %37 = vector.broadcast %36 : vector<1x16xf32> to vector<64x16xf32>
    %38 = arith.addf %35, %37 : vector<64x16xf32>
    %cst_45 = arith.constant 0.000000e+00 : f32
    %39 = vector.broadcast %cst_45 : f32 to vector<64x16xf32>
    %40 = arith.cmpf oge, %38, %39 : vector<64x16xf32>
    %cst_46 = arith.constant 2.000000e-01 : f32
    %41 = vector.broadcast %cst_46 : f32 to vector<64x16xf32>
    %42 = arith.mulf %41, %38 : vector<64x16xf32>
    %43 = arith.select %40, %38, %42 : vector<64x16xi1>, vector<64x16xf32>
    %cst_47 = arith.constant 1.41421354 : f32
    %44 = vector.broadcast %cst_47 : f32 to vector<64x16xf32>
    %45 = arith.mulf %43, %44 : vector<64x16xf32>
    %46 = vector.shape_cast %45 : vector<64x16xf32> to vector<8x8x16xf32>
    %c0_48 = arith.constant 0 : index
    %c0_49 = arith.constant 0 : index
    %c0_50 = arith.constant 0 : index
    %47 = vector.load %arg6[%c0_48, %c0_49, %c0_50] : memref<1x1x16xf32, #tpu.memory_space<vmem>>, vector<1x1x16xf32>
    %48 = vector.shape_cast %47 : vector<1x1x16xf32> to vector<1x16xf32>
    %49 = vector.shape_cast %48 : vector<1x16xf32> to vector<1x1x16xf32>
    %50 = vector.broadcast %49 : vector<1x1x16xf32> to vector<8x8x16xf32>
    %51 = arith.mulf %46, %50 : vector<8x8x16xf32>
    %c1_51 = arith.constant 1 : index
    %c1_52 = arith.constant 1 : index
    %c0_53 = arith.constant 0 : index
    %52 = vector.load %arg15[%c1_51, %c1_52, %c0_53] : memref<10x10x16xf32, #tpu.memory_space<vmem>>, vector<8x8x16xf32>
    tpu.vector_store %arg15[%c1_51, %c1_52, %c0_53], %51 {strides = array<i32>} : memref<10x10x16xf32, #tpu.memory_space<vmem>>, vector<8x8x16xf32>,
    %c0_54 = arith.constant 0 : index
    %c0_55 = arith.constant 0 : index
    %c0_56 = arith.constant 0 : index
    %53 = vector.load %arg15[%c0_54, %c0_55, %c0_56] : memref<10x10x16xf32, #tpu.memory_space<vmem>>, vector<8x8x16xf32>
    %54 = vector.shape_cast %53 : vector<8x8x16xf32> to vector<64x16xf32>
    %c0_57 = arith.constant 0 : index
    %c1_58 = arith.constant 1 : index
    %c0_59 = arith.constant 0 : index
    %55 = vector.load %arg15[%c0_57, %c1_58, %c0_59] : memref<10x10x16xf32, #tpu.memory_space<vmem>>, vector<8x8x16xf32>
    %56 = vector.shape_cast %55 : vector<8x8x16xf32> to vector<64x16xf32>
    %c0_60 = arith.constant 0 : index
    %c2_61 = arith.constant 2 : index
    %c0_62 = arith.constant 0 : index
    %57 = vector.load %arg15[%c0_60, %c2_61, %c0_62] : memref<10x10x16xf32, #tpu.memory_space<vmem>>, vector<8x8x16xf32>
    %58 = vector.shape_cast %57 : vector<8x8x16xf32> to vector<64x16xf32>
    %c1_63 = arith.constant 1 : index
    %c0_64 = arith.constant 0 : index
    %c0_65 = arith.constant 0 : index
    %59 = vector.load %arg15[%c1_63, %c0_64, %c0_65] : memref<10x10x16xf32, #tpu.memory_space<vmem>>, vector<8x8x16xf32>
    %60 = vector.shape_cast %59 : vector<8x8x16xf32> to vector<64x16xf32>
    %c1_66 = arith.constant 1 : index
    %c1_67 = arith.constant 1 : index
    %c0_68 = arith.constant 0 : index
    %61 = vector.load %arg15[%c1_66, %c1_67, %c0_68] : memref<10x10x16xf32, #tpu.memory_space<vmem>>, vector<8x8x16xf32>
    %62 = vector.shape_cast %61 : vector<8x8x16xf32> to vector<64x16xf32>
    %c1_69 = arith.constant 1 : index
    %c2_70 = arith.constant 2 : index
    %c0_71 = arith.constant 0 : index
    %63 = vector.load %arg15[%c1_69, %c2_70, %c0_71] : memref<10x10x16xf32, #tpu.memory_space<vmem>>, vector<8x8x16xf32>
    %64 = vector.shape_cast %63 : vector<8x8x16xf32> to vector<64x16xf32>
    %c2_72 = arith.constant 2 : index
    %c0_73 = arith.constant 0 : index
    %c0_74 = arith.constant 0 : index
    %65 = vector.load %arg15[%c2_72, %c0_73, %c0_74] : memref<10x10x16xf32, #tpu.memory_space<vmem>>, vector<8x8x16xf32>
    %66 = vector.shape_cast %65 : vector<8x8x16xf32> to vector<64x16xf32>
    %c2_75 = arith.constant 2 : index
    %c1_76 = arith.constant 1 : index
    %c0_77 = arith.constant 0 : index
    %67 = vector.load %arg15[%c2_75, %c1_76, %c0_77] : memref<10x10x16xf32, #tpu.memory_space<vmem>>, vector<8x8x16xf32>
    %68 = vector.shape_cast %67 : vector<8x8x16xf32> to vector<64x16xf32>
    %c2_78 = arith.constant 2 : index
    %c2_79 = arith.constant 2 : index
    %c0_80 = arith.constant 0 : index
    %69 = vector.load %arg15[%c2_78, %c2_79, %c0_80] : memref<10x10x16xf32, #tpu.memory_space<vmem>>, vector<8x8x16xf32>
    %70 = vector.shape_cast %69 : vector<8x8x16xf32> to vector<64x16xf32>
    %71 = tpu.concatenate %54, %56, %58, %60, %62, %64, %66, %68, %70 in 1 : vector<64x16xf32>, vector<64x16xf32>, vector<64x16xf32>, vector<64x16xf32>, vector<64x16xf32>, vector<64x16xf32>, vector<64x16xf32>, vector<64x16xf32>, vector<64x16xf32> -> vector<64x144xf32>
    %72 = arith.truncf %71 : vector<64x144xf32> to vector<64x144xbf16>
    %c0_81 = arith.constant 0 : index
    %c0_82 = arith.constant 0 : index
    %73 = vector.load %arg3[%c0_81, %c0_82] : memref<144x16xbf16, #tpu.memory_space<vmem>>, vector<144x16xbf16>
    %cst_83 = arith.constant dense<0.000000e+00> : vector<64x16xf32>
    %74 = tpu.matmul %72, %73, %cst_83 {dimension_numbers = #tpu.dot_dimension_numbers<[1], [0], [0], [1], [0, 0, 1, 1], [], []>} : vector<64x144xbf16>, vector<144x16xbf16>, vector<64x16xf32> -> vector<64x16xf32>
    %c0_84 = arith.constant 0 : index
    %c0_85 = arith.constant 0 : index
    %c0_86 = arith.constant 0 : index
    %75 = vector.load %arg9[%c0_84, %c0_85, %c0_86] : memref<1x1x16xf32, #tpu.memory_space<vmem>>, vector<1x1x16xf32>
    %76 = vector.shape_cast %75 : vector<1x1x16xf32> to vector<1x16xf32>
    %77 = vector.broadcast %76 : vector<1x16xf32> to vector<64x16xf32>
    %78 = arith.mulf %74, %77 : vector<64x16xf32>
    %c0_87 = arith.constant 0 : index
    %c0_88 = arith.constant 0 : index
    %79 = vector.load %arg12[%c0_87, %c0_88] : memref<1x16xf32, #tpu.memory_space<vmem>>, vector<1x16xf32>
    %80 = vector.broadcast %79 : vector<1x16xf32> to vector<64x16xf32>
    %81 = arith.addf %78, %80 : vector<64x16xf32>
    %cst_89 = arith.constant 0.000000e+00 : f32
    %82 = vector.broadcast %cst_89 : f32 to vector<64x16xf32>
    %83 = arith.cmpf oge, %81, %82 : vector<64x16xf32>
    %cst_90 = arith.constant 2.000000e-01 : f32
    %84 = vector.broadcast %cst_90 : f32 to vector<64x16xf32>
    %85 = arith.mulf %84, %81 : vector<64x16xf32>
    %86 = arith.select %83, %81, %85 : vector<64x16xi1>, vector<64x16xf32>
    %cst_91 = arith.constant 1.41421354 : f32
    %87 = vector.broadcast %cst_91 : f32 to vector<64x16xf32>
    %88 = arith.mulf %86, %87 : vector<64x16xf32>
    %89 = vector.shape_cast %88 : vector<64x16xf32> to vector<8x8x16xf32>
    %c0_92 = arith.constant 0 : index
    %c0_93 = arith.constant 0 : index
    %c0_94 = arith.constant 0 : index
    %90 = vector.load %arg7[%c0_92, %c0_93, %c0_94] : memref<1x1x16xf32, #tpu.memory_space<vmem>>, vector<1x1x16xf32>
    %91 = vector.shape_cast %90 : vector<1x1x16xf32> to vector<1x16xf32>
    %92 = vector.shape_cast %91 : vector<1x16xf32> to vector<1x1x16xf32>
    %93 = vector.broadcast %92 : vector<1x1x16xf32> to vector<8x8x16xf32>
    %94 = arith.mulf %89, %93 : vector<8x8x16xf32>
    %c1_95 = arith.constant 1 : index
    %c1_96 = arith.constant 1 : index
    %c0_97 = arith.constant 0 : index
    %95 = vector.load %arg15[%c1_95, %c1_96, %c0_97] : memref<10x10x16xf32, #tpu.memory_space<vmem>>, vector<8x8x16xf32>
    tpu.vector_store %arg15[%c1_95, %c1_96, %c0_97], %94 {strides = array<i32>} : memref<10x10x16xf32, #tpu.memory_space<vmem>>, vector<8x8x16xf32>,
    %c0_98 = arith.constant 0 : index
    %c0_99 = arith.constant 0 : index
    %c0_100 = arith.constant 0 : index
    %96 = vector.load %arg15[%c0_98, %c0_99, %c0_100] : memref<10x10x16xf32, #tpu.memory_space<vmem>>, vector<8x8x16xf32>
    %97 = vector.shape_cast %96 : vector<8x8x16xf32> to vector<64x16xf32>
    %c0_101 = arith.constant 0 : index
    %c1_102 = arith.constant 1 : index
    %c0_103 = arith.constant 0 : index
    %98 = vector.load %arg15[%c0_101, %c1_102, %c0_103] : memref<10x10x16xf32, #tpu.memory_space<vmem>>, vector<8x8x16xf32>
    %99 = vector.shape_cast %98 : vector<8x8x16xf32> to vector<64x16xf32>
    %c0_104 = arith.constant 0 : index
    %c2_105 = arith.constant 2 : index
    %c0_106 = arith.constant 0 : index
    %100 = vector.load %arg15[%c0_104, %c2_105, %c0_106] : memref<10x10x16xf32, #tpu.memory_space<vmem>>, vector<8x8x16xf32>
    %101 = vector.shape_cast %100 : vector<8x8x16xf32> to vector<64x16xf32>
    %c1_107 = arith.constant 1 : index
    %c0_108 = arith.constant 0 : index
    %c0_109 = arith.constant 0 : index
    %102 = vector.load %arg15[%c1_107, %c0_108, %c0_109] : memref<10x10x16xf32, #tpu.memory_space<vmem>>, vector<8x8x16xf32>
    %103 = vector.shape_cast %102 : vector<8x8x16xf32> to vector<64x16xf32>
    %c1_110 = arith.constant 1 : index
    %c1_111 = arith.constant 1 : index
    %c0_112 = arith.constant 0 : index
    %104 = vector.load %arg15[%c1_110, %c1_111, %c0_112] : memref<10x10x16xf32, #tpu.memory_space<vmem>>, vector<8x8x16xf32>
    %105 = vector.shape_cast %104 : vector<8x8x16xf32> to vector<64x16xf32>
    %c1_113 = arith.constant 1 : index
    %c2_114 = arith.constant 2 : index
    %c0_115 = arith.constant 0 : index
    %106 = vector.load %arg15[%c1_113, %c2_114, %c0_115] : memref<10x10x16xf32, #tpu.memory_space<vmem>>, vector<8x8x16xf32>
    %107 = vector.shape_cast %106 : vector<8x8x16xf32> to vector<64x16xf32>
    %c2_116 = arith.constant 2 : index
    %c0_117 = arith.constant 0 : index
    %c0_118 = arith.constant 0 : index
    %108 = vector.load %arg15[%c2_116, %c0_117, %c0_118] : memref<10x10x16xf32, #tpu.memory_space<vmem>>, vector<8x8x16xf32>
    %109 = vector.shape_cast %108 : vector<8x8x16xf32> to vector<64x16xf32>
    %c2_119 = arith.constant 2 : index
    %c1_120 = arith.constant 1 : index
    %c0_121 = arith.constant 0 : index
    %110 = vector.load %arg15[%c2_119, %c1_120, %c0_121] : memref<10x10x16xf32, #tpu.memory_space<vmem>>, vector<8x8x16xf32>
    %111 = vector.shape_cast %110 : vector<8x8x16xf32> to vector<64x16xf32>
    %c2_122 = arith.constant 2 : index
    %c2_123 = arith.constant 2 : index
    %c0_124 = arith.constant 0 : index
    %112 = vector.load %arg15[%c2_122, %c2_123, %c0_124] : memref<10x10x16xf32, #tpu.memory_space<vmem>>, vector<8x8x16xf32>
    %113 = vector.shape_cast %112 : vector<8x8x16xf32> to vector<64x16xf32>
    %114 = tpu.concatenate %97, %99, %101, %103, %105, %107, %109, %111, %113 in 1 : vector<64x16xf32>, vector<64x16xf32>, vector<64x16xf32>, vector<64x16xf32>, vector<64x16xf32>, vector<64x16xf32>, vector<64x16xf32>, vector<64x16xf32>, vector<64x16xf32> -> vector<64x144xf32>
    %115 = arith.truncf %114 : vector<64x144xf32> to vector<64x144xbf16>
    %c0_125 = arith.constant 0 : index
    %c0_126 = arith.constant 0 : index
    %116 = vector.load %arg4[%c0_125, %c0_126] : memref<144x12xbf16, #tpu.memory_space<vmem>>, vector<144x12xbf16>
    %cst_127 = arith.constant dense<0.000000e+00> : vector<64x12xf32>
    %117 = tpu.matmul %115, %116, %cst_127 {dimension_numbers = #tpu.dot_dimension_numbers<[1], [0], [0], [1], [0, 0, 1, 1], [], []>} : vector<64x144xbf16>, vector<144x12xbf16>, vector<64x12xf32> -> vector<64x12xf32>
    %c0_128 = arith.constant 0 : index
    %c0_129 = arith.constant 0 : index
    %c0_130 = arith.constant 0 : index
    %118 = vector.load %arg10[%c0_128, %c0_129, %c0_130] : memref<1x1x12xf32, #tpu.memory_space<vmem>>, vector<1x1x12xf32>
    %119 = vector.shape_cast %118 : vector<1x1x12xf32> to vector<1x12xf32>
    %120 = vector.broadcast %119 : vector<1x12xf32> to vector<64x12xf32>
    %121 = arith.mulf %117, %120 : vector<64x12xf32>
    %c0_131 = arith.constant 0 : index
    %c0_132 = arith.constant 0 : index
    %122 = vector.load %arg13[%c0_131, %c0_132] : memref<1x12xf32, #tpu.memory_space<vmem>>, vector<1x12xf32>
    %123 = vector.broadcast %122 : vector<1x12xf32> to vector<64x12xf32>
    %124 = arith.addf %121, %123 : vector<64x12xf32>
    %cst_133 = arith.constant 0.000000e+00 : f32
    %125 = vector.broadcast %cst_133 : f32 to vector<64x12xf32>
    %126 = arith.cmpf oge, %124, %125 : vector<64x12xf32>
    %cst_134 = arith.constant 2.000000e-01 : f32
    %127 = vector.broadcast %cst_134 : f32 to vector<64x12xf32>
    %128 = arith.mulf %127, %124 : vector<64x12xf32>
    %129 = arith.select %126, %124, %128 : vector<64x12xi1>, vector<64x12xf32>
    %cst_135 = arith.constant 1.41421354 : f32
    %130 = vector.broadcast %cst_135 : f32 to vector<64x12xf32>
    %131 = arith.mulf %129, %130 : vector<64x12xf32>
    %132 = vector.shape_cast %131 : vector<64x12xf32> to vector<8x8x12xf32>
    %c0_136 = arith.constant 0 : index
    %c0_137 = arith.constant 0 : index
    %c0_138 = arith.constant 0 : index
    %c0_139 = arith.constant 0 : index
    %133 = vector.load %arg14[%c0_136, %c0_137, %c0_138, %c0_139] : memref<1x8x8x12xf32, #tpu.memory_space<vmem>>, vector<1x8x8x12xf32>
    %134 = vector.shape_cast %133 : vector<1x8x8x12xf32> to vector<8x8x12xf32>
    %135 = vector.shape_cast %132 : vector<8x8x12xf32> to vector<1x8x8x12xf32>
    tpu.vector_store %arg14[%c0_136, %c0_137, %c0_138, %c0_139], %135 {strides = array<i32>} : memref<1x8x8x12xf32, #tpu.memory_space<vmem>>, vector<1x8x8x12xf32>,
    return
  }
  func.func @transform_0(%arg0: i32) -> (i32, i32, i32, i32) {
    %c0_i32 = arith.constant 0 : i32
    %c0_i32_0 = arith.constant 0 : i32
    %c0_i32_1 = arith.constant 0 : i32
    %c0_i32_2 = arith.constant 0 : i32
    return %arg0, %c0_i32, %c0_i32_0, %c0_i32_1 : i32, i32, i32, i32
  }
  func.func @transform_1(%arg0: i32) -> (i32, i32) {
    %c0_i32 = arith.constant 0 : i32
    %c0_i32_0 = arith.constant 0 : i32
    %c0_i32_1 = arith.constant 0 : i32
    return %c0_i32, %c0_i32_0 : i32, i32
  }
  func.func @transform_2(%arg0: i32) -> (i32, i32) {
    %c0_i32 = arith.constant 0 : i32
    %c0_i32_0 = arith.constant 0 : i32
    %c0_i32_1 = arith.constant 0 : i32
    return %c0_i32, %c0_i32_0 : i32, i32
  }
  func.func @transform_3(%arg0: i32) -> (i32, i32) {
    %c0_i32 = arith.constant 0 : i32
    %c0_i32_0 = arith.constant 0 : i32
    %c0_i32_1 = arith.constant 0 : i32
    return %c0_i32, %c0_i32_0 : i32, i32
  }
  func.func @transform_4(%arg0: i32) -> (i32, i32, i32) {
    %c0_i32 = arith.constant 0 : i32
    %c0_i32_0 = arith.constant 0 : i32
    %c0_i32_1 = arith.constant 0 : i32
    return %arg0, %c0_i32, %c0_i32_0 : i32, i32, i32
  }
  func.func @transform_5(%arg0: i32) -> (i32, i32, i32) {
    %c0_i32 = arith.constant 0 : i32
    %c0_i32_0 = arith.constant 0 : i32
    %c0_i32_1 = arith.constant 0 : i32
    return %arg0, %c0_i32, %c0_i32_0 : i32, i32, i32
  }
  func.func @transform_6(%arg0: i32) -> (i32, i32, i32) {
    %c0_i32 = arith.constant 0 : i32
    %c0_i32_0 = arith.constant 0 : i32
    %c0_i32_1 = arith.constant 0 : i32
    return %arg0, %c0_i32, %c0_i32_0 : i32, i32, i32
  }
  func.func @transform_7(%arg0: i32) -> (i32, i32, i32) {
    %c0_i32 = arith.constant 0 : i32
    %c0_i32_0 = arith.constant 0 : i32
    %c0_i32_1 = arith.constant 0 : i32
    return %arg0, %c0_i32, %c0_i32_0 : i32, i32, i32
  }
  func.func @transform_8(%arg0: i32) -> (i32, i32, i32) {
    %c0_i32 = arith.constant 0 : i32
    %c0_i32_0 = arith.constant 0 : i32
    %c0_i32_1 = arith.constant 0 : i32
    return %arg0, %c0_i32, %c0_i32_0 : i32, i32, i32
  }
  func.func @transform_9(%arg0: i32) -> (i32, i32, i32) {
    %c0_i32 = arith.constant 0 : i32
    %c0_i32_0 = arith.constant 0 : i32
    %c0_i32_1 = arith.constant 0 : i32
    return %arg0, %c0_i32, %c0_i32_0 : i32, i32, i32
  }
  func.func @transform_10(%arg0: i32) -> (i32, i32) {
    %c0_i32 = arith.constant 0 : i32
    %c0_i32_0 = arith.constant 0 : i32
    %c0_i32_1 = arith.constant 0 : i32
    return %c0_i32, %c0_i32_0 : i32, i32
  }
  func.func @transform_11(%arg0: i32) -> (i32, i32) {
    %c0_i32 = arith.constant 0 : i32
    %c0_i32_0 = arith.constant 0 : i32
    %c0_i32_1 = arith.constant 0 : i32
    return %c0_i32, %c0_i32_0 : i32, i32
  }
  func.func @transform_12(%arg0: i32) -> (i32, i32) {
    %c0_i32 = arith.constant 0 : i32
    %c0_i32_0 = arith.constant 0 : i32
    %c0_i32_1 = arith.constant 0 : i32
    return %c0_i32, %c0_i32_0 : i32, i32
  }
  func.func @transform_13(%arg0: i32) -> (i32, i32, i32, i32) {
    %c0_i32 = arith.constant 0 : i32
    %c0_i32_0 = arith.constant 0 : i32
    %c0_i32_1 = arith.constant 0 : i32
    %c0_i32_2 = arith.constant 0 : i32
    return %arg0, %c0_i32, %c0_i32_0, %c0_i32_1 : i32, i32, i32, i32
  }
}

</mosaic_0001>

<bundles_post_ra>
// kernel: refiner_dwt_forward.1
= control target key start
LH: loop header
LB: loop body
LE: loop exit
PB: predicated region body
PF: predicated region fallthrough
CT: control target
= control target key end

     0   :  { %s3185_s25 = smov 0   ;;  %s3960_s0 = inlined_call_operand.vmem [shape: f32[2,8,8,12], index: 0, kind: input, shape index: {}]   ;;  %s3961_s1 = inlined_call_operand.vmem [shape: bf16[108,16], index: 1, kind: input, shape index: {}]   ;;  %s3962_s2 = inlined_call_operand.vmem [shape: bf16[144,16], index: 2, kind: input, shape index: {}]   ;;  %s3963_s3 = inlined_call_operand.vmem [shape: bf16[144,12], index: 3, kind: input, shape index: {}]   ;;  %s3964_s4 = inlined_call_operand.vmem [shape: f32[2,1,12], index: 4, kind: input, shape index: {}]   ;;  %s3965_s5 = inlined_call_operand.vmem [shape: f32[2,1,16], index: 5, kind: input, shape index: {}]   ;;  %s3966_s6 = inlined_call_operand.vmem [shape: f32[2,1,16], index: 6, kind: input, shape index: {}]   ;;  %s3967_s7 = inlined_call_operand.vmem [shape: f32[2,1,16], index: 7, kind: input, shape index: {}]   ;;  %s3968_s8 = inlined_call_operand.vmem [shape: f32[2,1,16], index: 8, kind: input, shape index: {}]   ;;  %s3969_s9 = inlined_call_operand.vmem [shape: f32[2,1,12], index: 9, kind: input, shape index: {}]   ;;  %s3970_s10 = inlined_call_operand.vmem [shape: f32[1,16], index: 10, kind: input, shape index: {}]   ;;  %s3971_s11 = inlined_call_operand.vmem [shape: f32[1,16], index: 11, kind: input, shape index: {}]   ;;  %s3972_s12 = inlined_call_operand.vmem [shape: f32[1,12], index: 12, kind: input, shape index: {}]   ;;  %s3973_s13 = inlined_call_operand.vmem [shape: f32[2,8,8,12], index: 13, kind: output, shape index: {}]  }
   0x1 LB: > { %s2493_s26 = sadd.s32 4294967295, %s3098_s25   ;;  %p2497_p0 = scmp.ge.s32.totalorder %s3098_s25, 1  ;;  %s3098_s25 = sphi %s3185_s25, %s23_s25  }
   0x2   : > { %p435_p1 = scmp.lt.s32.totalorder %s3098_s25, 3 }
   0x4   : > { %p436_p2 = pnand %p2497_p0, %p435_p1 }
   0x5   : > { %p3193_p3 = scmp.lt.s32.totalorder (!%p436_p2), %s2493_s26, 1  ;;  %vm526_vm0 = vcmask (!%p436_p2), 130048   ;;  %vm528_vm1 = vcmask (!%p436_p2), 123904   ;;  %v3100_v0 = vmov (!%p436_p2), 0.0   ;;  %vm572_vm2 = vcmask (!%p436_p2), 97280   ;;  %v3067_v18 = vld [vmem:[%s3961_s1] sm:$0xff] (!%p436_p2)  }
   0x6   : > { %439 = sbr.rel (%p436_p2) target bundleno = 1196 (0x4ac), region = 72  ;;  %527 = vst.msk [vmem:[#allocation2] sm:$0xff] (!%p436_p2), %vm526_vm0, %v3100_v0  ;;  %530 = vst.msk [vmem:[#allocation2 + $0x10] sm:$0xff] (!%p436_p2), %vm526_vm0, %v3100_v0  ;;  %2563 = vmatprep.subr.bf16.mxu0 (!%p436_p2), %v3067_v18  ;;  %v3068_v21 = vld [vmem:[%s3961_s1 + $0x8] sm:$0xff] (!%p436_p2)   ;;  %s3101_s22 = smov (!%p436_p2), 24   ;;  %v3069_v39 = vld [vmem:[%s3961_s1 + $0x10] sm:$0xff] (!%p436_p2)  }
   0x7   : > { %529 = vst.msk [vmem:[#allocation2 + $0x8] sm:$0x3] (!%p436_p2), %vm528_vm1, %v3100_v0  ;;  %531 = vst.msk [vmem:[#allocation2 + $0x18] sm:$0x3] (!%p436_p2), %vm528_vm1, %v3100_v0  ;;  %2564 = vmatpush3.bf16.msra.mxu0 (!%p436_p2), %v3067_v18  ;;  %s3102_s23 = smov (!%p436_p2), 12   ;;  %v3070_v40 = vld [vmem:[%s3961_s1 + $0x18] sm:$0xff] (!%p436_p2)  }
   0x8   : > { %532 = vst.msk [vmem:[#allocation2 + $0x20] sm:$0xff] (!%p436_p2), %vm526_vm0, %v3100_v0  ;;  %534 = vst.msk [vmem:[#allocation2 + $0x30] sm:$0xff] (!%p436_p2), %vm526_vm0, %v3100_v0  ;;  %2565 = vmatprep.subr.bf16.mxu0 (!%p436_p2), %v3068_v21  ;;  %v3071_v44 = vld [vmem:[%s3961_s1 + $0x20] sm:$0xff] (!%p436_p2)   ;;  %v3072_v48 = vld [vmem:[%s3961_s1 + $0x28] sm:$0xff] (!%p436_p2)   ;;  %s3105_s20 = smov (!%p436_p2), 60   ;;  %vm1053_vm3 = vcmask (!%p436_p2), 1045504  }
   0x9   : > { %533 = vst.msk [vmem:[#allocation2 + $0x28] sm:$0x3] (!%p436_p2), %vm528_vm1, %v3100_v0  ;;  %535 = vst.msk [vmem:[#allocation2 + $0x38] sm:$0x3] (!%p436_p2), %vm528_vm1, %v3100_v0  ;;  %v3073_v52 = vld [vmem:[%s3961_s1 + $0x30] sm:$0x3f] (!%p436_p2)  }
   0xa   : > { %536 = vst.msk [vmem:[#allocation2 + $0x40] sm:$0xff] (!%p436_p2), %vm526_vm0, %v3100_v0  ;;  %538 = vst.msk [vmem:[#allocation2 + $0x50] sm:$0xff] (!%p436_p2), %vm526_vm0, %v3100_v0  ;;  %s3106_s27 = smov (!%p436_p2), 72   ;;  %v1055_v55 = vsel (!%p436_p2), %vm1053_vm3, %v3073_v52, 0  ;;  %s3107_s29 = smov (!%p436_p2), 84   ;;  %vm918_vm4 = vcmask (!%p436_p2), 195584  }
   0xb   : > { %537 = vst.msk [vmem:[#allocation2 + $0x48] sm:$0x3] (!%p436_p2), %vm528_vm1, %v3100_v0  ;;  %539 = vst.msk [vmem:[#allocation2 + $0x58] sm:$0x3] (!%p436_p2), %vm528_vm1, %v3100_v0  ;;  %2566 = vmatpush3.bf16.msra.mxu0 (!%p436_p2), %v3068_v21  ;;  %s3108_s30 = smov (!%p436_p2), 96   ;;  %vm927_vm5 = vcmask (!%p436_p2), 293888  }
   0xc   : > { %540 = vst.msk [vmem:[#allocation2 + $0x60] sm:$0xff] (!%p436_p2), %vm526_vm0, %v3100_v0  ;;  %542 = vst.msk [vmem:[#allocation2 + $0x70] sm:$0xff] (!%p436_p2), %vm526_vm0, %v3100_v0  ;;  %2567 = vmatprep.subr.bf16.mxu0 (!%p436_p2), %v3069_v39  ;;  %vm936_vm6 = vcmask (!%p436_p2), 392192   ;;  %vm945_vm7 = vcmask (!%p436_p2), 490496   ;;  %vm954_vm8 = vcmask (!%p436_p2), 588800   ;;  %vm963_vm9 = vcmask (!%p436_p2), 687104  }
   0xd   : > { %541 = vst.msk [vmem:[#allocation2 + $0x68] sm:$0x3] %vm528_vm1, %v3100_v0  ;;  %543 = vst.msk [vmem:[#allocation2 + $0x78] sm:$0x3] %vm528_vm1, %v3100_v0  ;;  %s3976_s26 = smov (!%p3193_p3, %s2493_s26), 1  ;;  %vm972_vm10 = vcmask 785408  }
   0xe   : > { %544 = vst.msk [vmem:[#allocation2 + $0x80] sm:$0xff] %vm526_vm0, %v3100_v0  ;;  %546 = vst.msk [vmem:[#allocation2 + $0x90] sm:$0xff] %vm526_vm0, %v3100_v0  ;;  %s2550_s28 = sshll.u32 %s3976_s26, 6  ;;  %s504_s14 = scalar_lea.vmem %s3964_s4, %s3976_s26  ;;  %v3241_v19 = vld [vmem:[#allocation2 + $0x2] sm:$0xff]  ;;  %vm1040_vm11 = vcmask 883712  }
   0xf   : > { %545 = vst.msk [vmem:[#allocation2 + $0x88] sm:$0x3] %vm528_vm1, %v3100_v0  ;;  %547 = vst.msk [vmem:[#allocation2 + $0x98] sm:$0x3] %vm528_vm1, %v3100_v0  ;;  %s501_s17 = scalar_lea.vmem %s3960_s0, %s2550_s28  ;;  %v2502_v1 = vld [vmem:[%s504_s14] ss:$0 sm:$0xff]  ;;  %2568 = vmatpush3.bf16.msra.mxu0 %v3069_v39  ;;  %s507_s15 = scalar_lea.vmem %s3965_s5, %s3976_s26 }
  0x10   : > { %v548_v2 = vld [vmem:[%s501_s17] sm:$0xff]  ;;  %v549_v3 = vld [vmem:[%s501_s17 + $0x8] sm:$0xff]  ;;  %v550_v4 = vld [vmem:[%s501_s17 + $0x10] sm:$0xff]  ;;  %s3103_s14 = smov 36   ;;  %2569 = vmatprep.subr.bf16.mxu0 %v3070_v40  ;;  %s3110_s21 = smov 32  }
  0x11   : > { %v563_v5 = vmul.f32 %v2502_v1, %v548_v2  ;;  %v564_v6 = vmul.f32 %v2502_v1, %v549_v3  ;;  %v565_v7 = vmul.f32 %v2502_v1, %v550_v4  ;;  %v551_v8 = vld [vmem:[%s501_s17 + $0x18] sm:$0xff]  ;;  %v552_v9 = vld [vmem:[%s501_s17 + $0x20] sm:$0xff]  ;;  %v553_v10 = vld [vmem:[%s501_s17 + $0x28] sm:$0xff]  ;;  %s3111_s24 = smov 16   ;;  %s3113_s18 = smov 80  }
  0x12   : > { %v566_v11 = vmul.f32 %v2502_v1, %v551_v8  ;;  %v567_v12 = vmul.f32 %v2502_v1, %v552_v9  ;;  %v554_v13 = vld [vmem:[%s501_s17 + $0x30] sm:$0xff]  ;;  %v568_v14 = vmul.f32 %v2502_v1, %v553_v10  ;;  %v555_v16 = vld [vmem:[%s501_s17 + $0x38] sm:$0xff]  ;;  %v3243_v20 = vld [vmem:[#allocation2 + $0x1] sm:$0xff]  ;;  %s3104_s17 = smov 48   ;;  %s3114_s19 = smov 112  }
  0x13   : > { %573 = vst.msk [vmem:[#allocation2 + $0x11] sm:$0xff] %vm572_vm2, %v563_v5  ;;  %574 = vst.msk [vmem:[#allocation2 + $0x21] sm:$0xff] %vm572_vm2, %v564_v6  ;;  %v569_v15 = vmul.f32 %v2502_v1, %v554_v13  ;;  %v570_v17 = vmul.f32 %v2502_v1, %v555_v16  ;;  %2570 = vmatpush3.bf16.msra.mxu0 %v3070_v40 }
  0x14   : > { %575 = vst.msk [vmem:[#allocation2 + $0x31] sm:$0xff] %vm572_vm2, %v565_v7  ;;  %576 = vst.msk [vmem:[#allocation2 + $0x41] sm:$0xff] %vm572_vm2, %v566_v11  ;;  %2571 = vmatprep.subr.bf16.mxu0 %v3071_v44 }
  0x15   : > { %577 = vst.msk [vmem:[#allocation2 + $0x51] sm:$0xff] %vm572_vm2, %v567_v12  ;;  %578 = vst.msk [vmem:[#allocation2 + $0x61] sm:$0xff] %vm572_vm2, %v568_v14  ;;  %v3315_v10 = vld [vmem:[#allocation2 + $0x90] sm:$0xff] }
  0x16   : > { %579 = vst.msk [vmem:[#allocation2 + $0x71] sm:$0xff] %vm572_vm2, %v569_v15  ;;  %580 = vst.msk [vmem:[#allocation2 + $0x81] sm:$0xff] %vm572_vm2, %v570_v17  ;;  %v3322_v13 = vld [vmem:[#allocation2 + $0x91] sm:$0xff] }
  0x17   : > { %2572 = vmatpush3.bf16.msra.mxu0 %v3071_v44  ;;  %v653_v15 = vld [vmem:[#allocation2 + $0x92] sm:$0xff] }
  0x18   : > { %2573 = vmatprep.subr.bf16.mxu0 %v3072_v48 }
  0x1a   : > { %v598_v22 = vld [vmem:[#allocation2 + $0x12] sm:$0xff]  ;;  %v599_v24 = vld [vmem:[#allocation2 + $0x22] sm:$0xff] }
  0x1b   : > { %v590_v23 = vld [vmem:[#allocation2 + $0x11] sm:$0xff]  ;;  %v2637_v25 = vpack.i.bf16 %v598_v22, %v3241_v19  ;;  %v591_v28 = vld [vmem:[#allocation2 + $0x21] sm:$0xff]  ;;  %v2667_v46 = vpack.i.bf16 %v599_v24, %v598_v22  ;;  %2574 = vmatpush3.bf16.msra.mxu0 %v3072_v48 }
  0x1c   : > { %v2627_v26 = vpack.i.bf16 %v590_v23, %v3243_v20  ;;  %v600_v27 = vld [vmem:[#allocation2 + $0x32] sm:$0xff]  ;;  %v3255_v33 = vld [vmem:[#allocation2 + $0x40] sm:$0xff]  ;;  %v2657_v42 = vpack.i.bf16 %v591_v28, %v590_v23  ;;  %2603 = vmatprep.subr.msk.bf16.mxu0 %vm1053_vm3, %v3073_v52 }
  0x1d   : > { %v592_v29 = vld [vmem:[#allocation2 + $0x31] sm:$0xff]  ;;  %2638 = vrot.lane.b32.xlu1 %v2637_v25, %s3101_s22  ;;  %v2642_v30 = vpack.i.bf16 %v600_v27, %v599_v24  ;;  %v3259_v35 = vld [vmem:[#allocation2 + $0x20] sm:$0xff] }
  0x1e   : > { %2628 = vrot.lane.b32.xlu0 %v2627_v26, %s3102_s23  ;;  %v2632_v31 = vpack.i.bf16 %v592_v29, %v591_v28  ;;  %v3253_v32 = vld [vmem:[#allocation2 + $0x30] sm:$0xff]  ;;  %v616_v38 = vld [vmem:[#allocation2 + $0x41] sm:$0xff] }
  0x1f   : > { %v3257_v34 = vld [vmem:[#allocation2 + $0x10] sm:$0xff]  ;;  %v2652_v36 = vpack.i.bf16 %v3255_v33, %v3253_v32  ;;  %v2662_v41 = vpack.i.bf16 %v616_v38, %v592_v29  ;;  %v624_v43 = vld [vmem:[#allocation2 + $0x42] sm:$0xff]  ;;  %v2677_v50 = vpack.i.bf16 %v3253_v32, %v3259_v35  ;;  %2576 = vmatpush3.bf16.msra.mxu0 %v1055_v55 }
  0x20   : > { %v2647_v37 = vpack.i.bf16 %v3259_v35, %v3257_v34  ;;  %v2672_v45 = vpack.i.bf16 %v624_v43, %v600_v27  ;;  %v3280_v47 = vld [vmem:[#allocation2 + $0x50] sm:$0xff]  ;;  %v595_v57 = vld [vmem:[#allocation2 + $0x61] sm:$0xff] }
  0x21   : > { %2643 = vrot.lane.b32.xlu1 %v2642_v30, %s3101_s22  ;;  %v2682_v49 = vpack.i.bf16 %v3280_v47, %v3255_v33  ;;  %v641_v51 = vld [vmem:[#allocation2 + $0x51] sm:$0xff]  ;;  %v603_v60 = vld [vmem:[#allocation2 + $0x62] sm:$0xff] }
  0x22   : > { %2633 = vrot.lane.b32.xlu0 %v2632_v31, %s3102_s23  ;;  %v2692_v53 = vpack.i.bf16 %v641_v51, %v616_v38  ;;  %v649_v54 = vld [vmem:[#allocation2 + $0x52] sm:$0xff]  ;;  %v612_v0 = vld [vmem:[#allocation2 + $0x80] sm:$0xff]  ;;  %v2737_v6 = vpack.i.bf16 %v595_v57, %v641_v51 }
  0x23   : > { %v2702_v56 = vpack.i.bf16 %v649_v54, %v624_v43  ;;  %v596_v58 = vld [vmem:[#allocation2 + $0x71] sm:$0xff]  ;;  %v3304_v1 = vld [vmem:[#allocation2 + $0x60] sm:$0xff]  ;;  %v2747_v9 = vpack.i.bf16 %v603_v60, %v649_v54  ;;  %v2762_v11 = vpack.i.bf16 %v3315_v10, %v612_v0 }
  0x24   : > { %v2712_v59 = vpack.i.bf16 %v596_v58, %v595_v57  ;;  %v604_v61 = vld [vmem:[#allocation2 + $0x72] sm:$0xff]  ;;  %v2727_v3 = vpack.i.bf16 %v3304_v1, %v3280_v47  ;;  %v620_v4 = vld [vmem:[#allocation2 + $0x81] sm:$0xff] }
  0x25   : > { %2653 = vrot.lane.b32.xlu1 %v2652_v36, %s3103_s14  ;;  %v2722_v62 = vpack.i.bf16 %v604_v61, %v603_v60  ;;  %v3302_v63 = vld [vmem:[#allocation2 + $0x70] sm:$0xff]  ;;  %v2742_v5 = vpack.i.bf16 %v620_v4, %v596_v58  ;;  %v628_v7 = vld [vmem:[#allocation2 + $0x82] sm:$0xff]  ;;  %v2772_v14 = vpack.i.bf16 %v3322_v13, %v620_v4 }
  0x26   : > { %2648 = vrot.lane.b32.xlu0 %v2647_v37, %s3103_s14  ;;  %v2732_v2 = vpack.i.bf16 %v612_v0, %v3302_v63  ;;  %v2752_v8 = vpack.i.bf16 %v628_v7, %v604_v61  ;;  %v2757_v12 = vpack.i.bf16 %v3302_v63, %v3304_v1  ;;  %v2782_v16 = vpack.i.bf16 %v653_v15, %v628_v7 }
  0x29   : > { %2663 = vrot.lane.b32.xlu1 %v2662_v41, %s3104_s17 }
  0x2a   : > { %2658 = vrot.lane.b32.xlu0 %v2657_v42, %s3104_s17 }
  0x2d   : > { %2673 = vrot.lane.b32.xlu1 %v2672_v45, %s3105_s20 }
  0x2e   : > { %2668 = vrot.lane.b32.xlu0 %v2667_v46, %s3105_s20 }
  0x31   : > { %2683 = vrot.lane.b32.xlu1 %v2682_v49, %s3106_s27 }
  0x32   : > { %2678 = vrot.lane.b32.xlu0 %v2677_v50, %s3106_s27 }
  0x35   : > { %2693 = vrot.lane.b32.xlu1 %v2692_v53, %s3107_s29 }
  0x36   : > { %2688 = vrot.lane.b32.xlu0 %v2632_v31, %s3107_s29  ;;  %v3331_v31 = vld [vmem:[#allocation2] sm:$0xff] }
  0x39   : > { %2703 = vrot.lane.b32.xlu1 %v2702_v56, %s3108_s30 }
  0x3a   : > { %2698 = vrot.lane.b32.xlu0 %v2642_v30, %s3108_s30 }
  0x3d   : > { %2713 = vrot.lane.b32.xlu1 %v2712_v59, %s3102_s23 }
  0x3e   : > { %2708 = vrot.lane.b32.xlu0 %v2692_v53, %s3102_s23 }
  0x41   : > { %2723 = vrot.lane.b32.xlu1 %v2722_v62, %s3101_s22 }
  0x42   : > { %2718 = vrot.lane.b32.xlu0 %v2702_v56, %s3101_s22  ;;  %s516_s22 = scalar_lea.vmem %s3968_s8, %s3976_s26 }
  0x45   : > { %2733 = vrot.lane.b32.xlu1 %v2732_v2, %s3103_s14 }
  0x46   : > { %2728 = vrot.lane.b32.xlu0 %v2727_v3, %s3103_s14  ;;  %s3112_s14 = smov 64  }
  0x49   : > { %2743 = vrot.lane.b32.xlu1 %v2742_v5, %s3104_s17 }
  0x4a   : > { %2738 = vrot.lane.b32.xlu0 %v2737_v6, %s3104_s17 }
  0x4d   : > { %2753 = vrot.lane.b32.xlu1 %v2752_v8, %s3105_s20 }
  0x4e   : > { %2748 = vrot.lane.b32.xlu0 %v2747_v9, %s3105_s20 }
  0x51   : > { %2763 = vrot.lane.b32.xlu1 %v2762_v11, %s3106_s27 }
  0x52   : > { %2758 = vrot.lane.b32.xlu0 %v2757_v12, %s3106_s27  ;;  %s513_s27 = scalar_lea.vmem %s3967_s7, %s3976_s26 }
  0x55   : > { %2773 = vrot.lane.b32.xlu1 %v2772_v14, %s3107_s29 }
  0x56   : > { %2768 = vrot.lane.b32.xlu0 %v2712_v59, %s3107_s29 }
  0x59   : > { %2783 = vrot.lane.b32.xlu1 %v2782_v16, %s3108_s30 }
  0x5a   : > { %2778 = vrot.lane.b32.xlu0 %v2722_v62, %s3108_s30 }
  0x8f   : > { %v2639_v17 = vpop.permute.xlu1 %2638 }
  0x90   : > { %v2629_v18 = vpop.permute.xlu0 %2628  ;;  %v2641_v36 = vunpack.i.h.bf16 %v2639_v17  ;;  %v2640_v37 = vunpack.i.l.bf16 %v2639_v17 }
  0x91   : > { %v2631_v27 = vunpack.i.h.bf16 %v2629_v18  ;;  %v2630_v28 = vunpack.i.l.bf16 %v2629_v18 }
  0x93   : > { %v2644_v21 = vpop.permute.xlu1 %2643  ;;  %v910_v42 = vsel %vm572_vm2, %v3331_v31, %v2630_v28  ;;  %v911_v43 = vsel %vm572_vm2, %v3257_v34, %v2631_v27 }
  0x94   : > { %v2634_v22 = vpop.permute.xlu0 %2633  ;;  %v2646_v38 = vunpack.i.h.bf16 %v2644_v21  ;;  %v2645_v39 = vunpack.i.l.bf16 %v2644_v21  ;;  %v919_v34 = vsel %vm918_vm4, %v910_v42, %v2640_v37  ;;  %v920_v53 = vsel %vm918_vm4, %v911_v43, %v2641_v36 }
  0x95   : > { %v2636_v29 = vunpack.i.h.bf16 %v2634_v22  ;;  %v2635_v30 = vunpack.i.l.bf16 %v2634_v22 }
  0x97   : > { %v2654_v23 = vpop.permute.xlu1 %2653  ;;  %v913_v44 = vsel %vm572_vm2, %v3253_v32, %v2636_v29  ;;  %v912_v45 = vsel %vm572_vm2, %v3259_v35, %v2635_v30 }
  0x98   : > { %v2649_v24 = vpop.permute.xlu0 %2648  ;;  %v2656_v46 = vunpack.i.h.bf16 %v2654_v23  ;;  %v2655_v48 = vunpack.i.l.bf16 %v2654_v23  ;;  %v921_v51 = vsel %vm918_vm4, %v912_v45, %v2645_v39  ;;  %v922_v52 = vsel %vm918_vm4, %v913_v44, %v2646_v38 }
  0x99   : > { %v2651_v49 = vunpack.i.h.bf16 %v2649_v24  ;;  %v2650_v50 = vunpack.i.l.bf16 %v2649_v24 }
  0x9a   : > { %v930_v58 = vsel %vm927_vm5, %v921_v51, %v2655_v48  ;;  %v931_v59 = vsel %vm927_vm5, %v922_v52, %v2656_v46 }
  0x9b   : > { %v2664_v25 = vpop.permute.xlu1 %2663  ;;  %v928_v60 = vsel %vm927_vm5, %v919_v34, %v2650_v50  ;;  %v929_v61 = vsel %vm927_vm5, %v920_v53, %v2651_v49 }
  0x9c   : > { %v2659_v26 = vpop.permute.xlu0 %2658  ;;  %v2666_v35 = vunpack.i.h.bf16 %v2664_v25  ;;  %v2665_v55 = vunpack.i.l.bf16 %v2664_v25 }
  0x9d   : > { %v2661_v56 = vunpack.i.h.bf16 %v2659_v26  ;;  %v2660_v57 = vunpack.i.l.bf16 %v2659_v26 }
  0x9e   : > { %v939_v11 = vsel %vm936_vm6, %v930_v58, %v2665_v55  ;;  %v940_v12 = vsel %vm936_vm6, %v931_v59, %v2666_v35 }
  0x9f   : > { %v2674_v40 = vpop.permute.xlu1 %2673  ;;  %v937_v14 = vsel %vm936_vm6, %v928_v60, %v2660_v57  ;;  %v938_v15 = vsel %vm936_vm6, %v929_v61, %v2661_v56 }
  0xa0   : > { %v2669_v41 = vpop.permute.xlu0 %2668  ;;  %v2676_v62 = vunpack.i.h.bf16 %v2674_v40  ;;  %v2675_v0 = vunpack.i.l.bf16 %v2674_v40 }
  0xa1   : > { %v2671_v2 = vunpack.i.h.bf16 %v2669_v41  ;;  %v2670_v3 = vunpack.i.l.bf16 %v2669_v41 }
  0xa2   : > { %v948_v22 = vsel %vm945_vm7, %v939_v11, %v2675_v0  ;;  %v949_v23 = vsel %vm945_vm7, %v940_v12, %v2676_v62 }
  0xa3   : > { %v2684_v32 = vpop.permute.xlu1 %2683  ;;  %v946_v24 = vsel %vm945_vm7, %v937_v14, %v2670_v3  ;;  %v947_v25 = vsel %vm945_vm7, %v938_v15, %v2671_v2 }
  0xa4   : > { %v2679_v54 = vpop.permute.xlu0 %2678  ;;  %v2686_v4 = vunpack.i.h.bf16 %v2684_v32  ;;  %v2685_v5 = vunpack.i.l.bf16 %v2684_v32 }
  0xa5   : > { %v2681_v6 = vunpack.i.h.bf16 %v2679_v54  ;;  %v2680_v7 = vunpack.i.l.bf16 %v2679_v54 }
  0xa6   : > { %v957_v26 = vsel %vm954_vm8, %v948_v22, %v2685_v5  ;;  %v958_v27 = vsel %vm954_vm8, %v949_v23, %v2686_v4 }
  0xa7   : > { %v2694_v8 = vpop.permute.xlu1 %2693  ;;  %v955_v28 = vsel %vm954_vm8, %v946_v24, %v2680_v7  ;;  %v956_v29 = vsel %vm954_vm8, %v947_v25, %v2681_v6 }
  0xa8   : > { %v2689_v9 = vpop.permute.xlu0 %2688  ;;  %v2696_v16 = vunpack.i.h.bf16 %v2694_v8  ;;  %v2695_v17 = vunpack.i.l.bf16 %v2694_v8 }
  0xa9   : > { %v2691_v18 = vunpack.i.h.bf16 %v2689_v9  ;;  %v2690_v21 = vunpack.i.l.bf16 %v2689_v9 }
  0xaa   : > { %v966_v41 = vsel %vm963_vm9, %v957_v26, %v2695_v17  ;;  %v967_v42 = vsel %vm963_vm9, %v958_v27, %v2696_v16 }
  0xab   : > { %v2704_v30 = vpop.permute.xlu1 %2703  ;;  %v964_v43 = vsel %vm963_vm9, %v955_v28, %v2690_v21  ;;  %v965_v44 = vsel %vm963_vm9, %v956_v29, %v2691_v18 }
  0xac   : > { %v2699_v36 = vpop.permute.xlu0 %2698  ;;  %v2706_v37 = vunpack.i.h.bf16 %v2704_v30  ;;  %v2705_v38 = vunpack.i.l.bf16 %v2704_v30 }
  0xad   : > { %v2701_v39 = vunpack.i.h.bf16 %v2699_v36  ;;  %v2700_v40 = vunpack.i.l.bf16 %v2699_v36 }
  0xae   : > { %v975_v45 = vsel %vm972_vm10, %v966_v41, %v2705_v38  ;;  %v976_v46 = vsel %vm972_vm10, %v967_v42, %v2706_v37 }
  0xaf   : > { %v973_v48 = vsel %vm972_vm10, %v964_v43, %v2700_v40  ;;  %v974_v49 = vsel %vm972_vm10, %v965_v44, %v2701_v39  ;;  %v982_v50 = vpack.c.bf16 %v976_v46, %v975_v45  ;;  %v2714_v51 = vpop.permute.xlu1 %2713 }
  0xb0   : > { %v2709_v52 = vpop.permute.xlu0 %2708  ;;  %v981_v34 = vpack.c.bf16 %v974_v49, %v973_v48  ;;  %v2716_v57 = vunpack.i.h.bf16 %v2714_v51  ;;  %v2715_v58 = vunpack.i.l.bf16 %v2714_v51 }
  0xb1   : > { %v2711_v59 = vunpack.i.h.bf16 %v2709_v52  ;;  %v2710_v60 = vunpack.i.l.bf16 %v2709_v52 }
  0xb2   : > { %2577 = vmatprep.mubr.msk.bf16.mxu0 %vm1040_vm11, %v981_v34  ;;  %v917_v9 = vsel %vm572_vm2, %v3302_v63, %v2716_v57  ;;  %v916_v11 = vsel %vm572_vm2, %v3304_v1, %v2715_v58 }
  0xb3   : > { %2578 = vmatmul.mubr.msk.bf16.vlgmr.msra.gmra.mrb[0].mxu0 %vm1040_vm11, %v982_v50  ;;  %v2724_v53 = vpop.permute.xlu1 %2723  ;;  %v915_v12 = vsel %vm572_vm2, %v3280_v47, %v2711_v59  ;;  %v914_v14 = vsel %vm572_vm2, %v3255_v33, %v2710_v60 }
  0xb4   : > { %v2719_v32 = vpop.permute.xlu0 %2718  ;;  %v2726_v61 = vunpack.i.h.bf16 %v2724_v53  ;;  %v2725_v62 = vunpack.i.l.bf16 %v2724_v53 }
  0xb5   : > { %v2721_v0 = vunpack.i.h.bf16 %v2719_v32  ;;  %v2720_v2 = vunpack.i.l.bf16 %v2719_v32 }
  0xb6   : > { %v925_v15 = vsel %vm918_vm4, %v916_v11, %v2725_v62  ;;  %v926_v16 = vsel %vm918_vm4, %v917_v9, %v2726_v61  ;;  %v3074_v11 = vld [vmem:[%s3962_s2] sm:$0xff]  }
  0xb7   : > { %v2734_v54 = vpop.permute.xlu1 %2733  ;;  %v923_v17 = vsel %vm918_vm4, %v914_v14, %v2720_v2  ;;  %v924_v18 = vsel %vm918_vm4, %v915_v12, %v2721_v0  ;;  %v3109_v12 = vmov 0   ;;  %v3075_v14 = vld [vmem:[%s3962_s2 + $0x8] sm:$0xff]  }
  0xb8   : > { %v2729_v35 = vpop.permute.xlu0 %2728  ;;  %v2736_v5 = vunpack.i.h.bf16 %v2734_v54  ;;  %v2735_v6 = vunpack.i.l.bf16 %v2734_v54  ;;  %1655 = vmatprep.subr.bf16.mxu1 %v3109_v12  ;;  %2249 = vmatprep.subr.bf16.mxu0 %v3109_v12 }
  0xb9   : > { %v2731_v7 = vunpack.i.h.bf16 %v2729_v35  ;;  %v2730_v8 = vunpack.i.l.bf16 %v2729_v35  ;;  %1656 = vmatpush1.bf16.msra.mxu1 %v3074_v11 }
  0xba   : > { %v934_v25 = vsel %vm927_vm5, %v925_v15, %v2735_v6  ;;  %v935_v47 = vsel %vm927_vm5, %v926_v16, %v2736_v5  ;;  %1657 = vmatprep.subr.bf16.mxu1 %v3109_v12  ;;  %v3076_v15 = vld [vmem:[%s3962_s2 + $0x10] sm:$0xff]   ;;  %v3077_v16 = vld [vmem:[%s3962_s2 + $0x18] sm:$0xff]  }
  0xbb   : > { %v2744_v55 = vpop.permute.xlu1 %2743  ;;  %v932_v33 = vsel %vm927_vm5, %v923_v17, %v2730_v8  ;;  %v933_v26 = vsel %vm927_vm5, %v924_v18, %v2731_v7  ;;  %v3431_v17 = vld [vmem:[%s513_s27] ss:$0 sm:$0xff]  ;;  %s510_s27 = scalar_lea.vmem %s3966_s6, %s3976_s26 }
  0xbc   : > { %v2739_v56 = vpop.permute.xlu0 %2738  ;;  %v2746_v63 = vunpack.i.h.bf16 %v2744_v55  ;;  %v2745_v23 = vunpack.i.l.bf16 %v2744_v55 }
  0xbd   : > { %v2741_v24 = vunpack.i.h.bf16 %v2739_v56  ;;  %v2740_v1 = vunpack.i.l.bf16 %v2739_v56  ;;  %1658 = vmatpush1.bf16.msra.mxu1 %v3075_v14 }
  0xbe   : > { %v943_v42 = vsel %vm936_vm6, %v934_v25, %v2745_v23  ;;  %v944_v43 = vsel %vm936_vm6, %v935_v47, %v2746_v63  ;;  %1659 = vmatprep.subr.bf16.mxu1 %v3109_v12 }
  0xbf   : > { %v2754_v3 = vpop.permute.xlu1 %2753  ;;  %v941_v44 = vsel %vm936_vm6, %v932_v33, %v2740_v1  ;;  %v942_v45 = vsel %vm936_vm6, %v933_v26, %v2741_v24 }
  0xc0   : > { %v2749_v4 = vpop.permute.xlu0 %2748  ;;  %v2756_v27 = vunpack.i.h.bf16 %v2754_v3  ;;  %v2755_v28 = vunpack.i.l.bf16 %v2754_v3 }
  0xc1   : > { %v2751_v29 = vunpack.i.h.bf16 %v2749_v4  ;;  %v2750_v30 = vunpack.i.l.bf16 %v2749_v4  ;;  %1660 = vmatpush1.bf16.msra.mxu1 %v3076_v15 }
  0xc2   : > { %v952_v51 = vsel %vm945_vm7, %v943_v42, %v2755_v28  ;;  %v953_v52 = vsel %vm945_vm7, %v944_v43, %v2756_v27  ;;  %1661 = vmatprep.subr.bf16.mxu1 %v3109_v12 }
  0xc3   : > { %v2764_v21 = vpop.permute.xlu1 %2763  ;;  %v950_v34 = vsel %vm945_vm7, %v941_v44, %v2750_v30  ;;  %v951_v53 = vsel %vm945_vm7, %v942_v45, %v2751_v29  ;;  %vm1511_vm7 = vcmask 261120  }
  0xc4   : > { %v2759_v22 = vpop.permute.xlu0 %2758  ;;  %v2766_v36 = vunpack.i.h.bf16 %v2764_v21  ;;  %v2765_v37 = vunpack.i.l.bf16 %v2764_v21  ;;  %v3436_v21 = vld [vmem:[%s3970_s10] ss:$0 sm:$0xff] }
  0xc5   : > { %v2761_v38 = vunpack.i.h.bf16 %v2759_v22  ;;  %v2760_v39 = vunpack.i.l.bf16 %v2759_v22  ;;  %1662 = vmatpush1.bf16.msra.mxu1 %v3077_v16 }
  0xc6   : > { %v961_v32 = vsel %vm954_vm8, %v952_v51, %v2765_v37  ;;  %v962_v54 = vsel %vm954_vm8, %v953_v52, %v2766_v36  ;;  %1663 = vmatprep.subr.bf16.mxu1 %v3109_v12  ;;  %v3450_v37 = vld [vmem:[%s507_s15] ss:$0 sm:$0xff]  ;;  %s3933_s15 = scalar_lea.vmem %s3973_s13, %s2550_s28 }
  0xc7   : > { %v2774_v40 = vpop.permute.xlu1 %2773  ;;  %v959_v35 = vsel %vm954_vm8, %v950_v34, %v2760_v39  ;;  %v960_v55 = vsel %vm954_vm8, %v951_v53, %v2761_v38  ;;  %v3078_v51 = vld [vmem:[%s3962_s2 + $0x20] sm:$0xff]   ;;  %v3079_v34 = vld [vmem:[%s3962_s2 + $0x28] sm:$0xff]   ;;  %vm1528_vm8 = vcmask 523264  }
  0xc8   : > { %v2769_v41 = vpop.permute.xlu0 %2768  ;;  %v2776_v46 = vunpack.i.h.bf16 %v2774_v40  ;;  %v2775_v48 = vunpack.i.l.bf16 %v2774_v40 }
  0xc9   : > { %v2771_v49 = vunpack.i.h.bf16 %v2769_v41  ;;  %v2770_v50 = vunpack.i.l.bf16 %v2769_v41  ;;  %1664 = vmatpush1.bf16.msra.mxu1 %v3078_v51 }
  0xca   : > { %v970_v62 = vsel %vm963_vm9, %v961_v32, %v2775_v48  ;;  %v971_v0 = vsel %vm963_vm9, %v962_v54, %v2776_v46  ;;  %1665 = vmatprep.subr.bf16.mxu1 %v3109_v12 }
  0xcb   : > { %v2784_v56 = vpop.permute.xlu1 %2783  ;;  %v968_v2 = vsel %vm963_vm9, %v959_v35, %v2770_v50  ;;  %v969_v3 = vsel %vm963_vm9, %v960_v55, %v2771_v49  ;;  %vm1537_vm9 = vcmask 654336  }
  0xcc   : > { %v2779_v57 = vpop.permute.xlu0 %2778  ;;  %v2786_v58 = vunpack.i.h.bf16 %v2784_v56  ;;  %v2785_v59 = vunpack.i.l.bf16 %v2784_v56 }
  0xcd   : > { %v2781_v60 = vunpack.i.h.bf16 %v2779_v57  ;;  %v2780_v61 = vunpack.i.l.bf16 %v2779_v57  ;;  %1666 = vmatpush1.bf16.msra.mxu1 %v3079_v34 }
  0xce   : > { %v979_v4 = vsel %vm972_vm10, %v970_v62, %v2785_v59  ;;  %v980_v5 = vsel %vm972_vm10, %v971_v0, %v2786_v58  ;;  %1667 = vmatprep.subr.bf16.mxu1 %v3109_v12  ;;  %v3081_v0 = vld [vmem:[%s3962_s2 + $0x38] sm:$0xff]  }
  0xcf   : > { %v977_v6 = vsel %vm972_vm10, %v968_v2, %v2780_v61  ;;  %v978_v7 = vsel %vm972_vm10, %v969_v3, %v2781_v60  ;;  %v984_v8 = vpack.c.bf16 %v980_v5, %v979_v4 }
  0xd0   : > { %v983_v9 = vpack.c.bf16 %v978_v7, %v977_v6  ;;  %v3082_v7 = vld [vmem:[%s3962_s2 + $0x40] sm:$0xff]  }
  0xd2   : > { %2581 = vmatprep.mubr.msk.bf16.mxu0 %vm1040_vm11, %v983_v9 }
  0xd3   : > { %2582 = vmatmul.mubr.msk.bf16.gmra.mrb[4].mxu0 %vm1040_vm11, %v984_v8  ;;  %vm1554_vm11 = vcmask 916480  }
 0x186   : > { %v2579_v18 = vpop.f32.mrb[0].mxu0 }
 0x187   : > { %v1131_v22 = vmul.f32 %v2579_v18, %v3431_v17  ;;  %v1091_v63 = vpop.f32.mrb[1].mxu0 }
 0x188   : > { %v1129_v23 = vmul.f32 %v3431_v17, %v1091_v63  ;;  %v2580_v24 = vpop.f32.mrb[2].mxu0 }
 0x189   : > { %v1146_v1 = vadd.f32 %v3436_v21, %v1131_v22  ;;  %v1132_v25 = vmul.f32 %v2580_v24, %v3431_v17  ;;  %v1094_v47 = vpop.f32.mrb[3].mxu0 }
 0x18a   : > { %v1144_v33 = vadd.f32 %v3436_v21, %v1129_v23  ;;  %v1130_v26 = vmul.f32 %v3431_v17, %v1094_v47 }
 0x18b   : > { %vm1154_vm12 = vcmp.ge.f32.partialorder %v1146_v1, 0.0  ;;  %v1162_v27 = vmul.f32 0.2, %v1146_v1  ;;  %v1147_v28 = vadd.f32 %v3436_v21, %v1132_v25 }
 0x18c   : > { %vm1152_vm13 = vcmp.ge.f32.partialorder %v1144_v33, 0.0  ;;  %v1160_v29 = vmul.f32 0.2, %v1144_v33  ;;  %v1145_v30 = vadd.f32 %v3436_v21, %v1130_v26 }
 0x18d   : > { %v1170_v36 = vsel %vm1154_vm12, %v1146_v1, %v1162_v27  ;;  %vm1155_vm14 = vcmp.ge.f32.partialorder %v1147_v28, 0.0  ;;  %v1163_v38 = vmul.f32 0.2, %v1147_v28 }
 0x18e   : > { %v1178_v39 = vmul.f32 1.4142135, %v1170_v36  ;;  %v1168_v40 = vsel %vm1152_vm13, %v1144_v33, %v1160_v29  ;;  %vm1153_vm15 = vcmp.ge.f32.partialorder %v1145_v30, 0.0  ;;  %v1161_v41 = vmul.f32 0.2, %v1145_v30 }
 0x18f   : > { %v1176_v42 = vmul.f32 1.4142135, %v1168_v40  ;;  %v1171_v43 = vsel %vm1155_vm14, %v1147_v28, %v1163_v38 }
 0x190   : > { %v1193_v44 = vmul.f32 %v3450_v37, %v1178_v39  ;;  %v1179_v45 = vmul.f32 1.4142135, %v1171_v43  ;;  %v1169_v46 = vsel %vm1153_vm15, %v1145_v30, %v1161_v41 }
 0x191   : > { %v1191_v48 = vmul.f32 %v3450_v37, %v1176_v42  ;;  %v1177_v49 = vmul.f32 1.4142135, %v1169_v46 }
 0x192   : > { %1201 = vst.msk [vmem:[#allocation2 + $0x31] sm:$0xff] %vm526_vm0, %v1193_v44  ;;  %v1194_v50 = vmul.f32 %v3450_v37, %v1179_v45 }
 0x193   : > { %1199 = vst.msk [vmem:[#allocation2 + $0x11] sm:$0xff] %vm526_vm0, %v1191_v48  ;;  %v1192_v52 = vmul.f32 %v3450_v37, %v1177_v49 }
 0x194   : > { %1202 = vst.msk [vmem:[#allocation2 + $0x41] sm:$0xff] %vm526_vm0, %v1194_v50 }
 0x195   : > { %1200 = vst.msk [vmem:[#allocation2 + $0x21] sm:$0xff] %vm526_vm0, %v1192_v52 }
 0x199   : > { %v3470_v55 = vld [vmem:[#allocation2 + $0x32] sm:$0xff] }
 0x19a   : > { %v1224_v53 = vld [vmem:[#allocation2 + $0x12] sm:$0xff] }
 0x19b   : > { %v1216_v32 = vld [vmem:[#allocation2 + $0x11] sm:$0xff]  ;;  %v2792_v54 = vpack.i.bf16 %v1224_v53, %v3241_v19  ;;  %v3474_v57 = vld [vmem:[#allocation2 + $0x41] sm:$0xff] }
 0x19c   : > { %v2787_v35 = vpack.i.bf16 %v1216_v32, %v3243_v20  ;;  %v3472_v56 = vld [vmem:[#allocation2 + $0x22] sm:$0xff]  ;;  %v3080_v19 = vld [vmem:[%s3962_s2 + $0x30] sm:$0xff]  }
 0x19d   : > { %v3476_v58 = vld [vmem:[#allocation2 + $0x40] sm:$0xff]  ;;  %2793 = vrot.lane.b32.xlu1 %v2792_v54, %s3110_s21  ;;  %v1564_v59 = vpack.c.bf16 %v3470_v55, %v3472_v56  ;;  %v1241_v20 = vld [vmem:[#allocation2 + $0x31] sm:$0xff]  ;;  %1668 = vmatpush1.bf16.msra.mxu1 %v3080_v19  ;;  %v2822_v16 = vpack.i.bf16 %v3472_v56, %v1224_v53  ;;  %v2842_v42 = vpack.i.bf16 %v3470_v55, %v3472_v56 }
 0x19e   : > { %2788 = vrot.lane.b32.xlu0 %v2787_v35, %s3111_s24  ;;  %v3485_v60 = vld [vmem:[#allocation2 + $0x30] sm:$0xff]  ;;  %v2802_v61 = vpack.i.bf16 %v3474_v57, %v1241_v20  ;;  %v3494_v2 = vld [vmem:[#allocation2 + $0x42] sm:$0xff]  ;;  %1669 = vmatprep.subr.bf16.mxu1 %v3109_v12 }
 0x19f   : > { %2526 = vmatprep.mubr.msk.bf16.mxu1 %vm526_vm0, %v1564_v59  ;;  %v2797_v62 = vpack.i.bf16 %v3476_v58, %v3485_v60  ;;  %v3496_v3 = vld [vmem:[#allocation2 + $0x20] sm:$0xff]  ;;  %v3501_v4 = vld [vmem:[#allocation2 + $0x10] sm:$0xff]  ;;  %v2807_v5 = vpack.i.bf16 %v3494_v2, %v3470_v55 }
 0x1a0   : > { %v2812_v6 = vpack.i.bf16 %v3496_v3, %v3501_v4  ;;  %v1240_v8 = vld [vmem:[#allocation2 + $0x21] sm:$0xff]  ;;  %v2827_v47 = vpack.i.bf16 %v3485_v60, %v3496_v3 }
 0x1a1   : > { %2798 = vrot.lane.b32.xlu1 %v2797_v62, %s3104_s17  ;;  %1670 = vmatpush1.bf16.msra.mxu1 %v3081_v0  ;;  %v2817_v15 = vpack.i.bf16 %v1240_v8, %v1216_v32  ;;  %v2832_v27 = vpack.i.bf16 %v1241_v20, %v1240_v8 }
 0x1a2   : > { %2803 = vrot.lane.b32.xlu0 %v2802_v61, %s3112_s14  ;;  %1671 = vmatprep.subr.bf16.mxu1 %v3109_v12 }
 0x1a5   : > { %2808 = vrot.lane.b32.xlu1 %v2807_v5, %s3113_s18  ;;  %1672 = vmatpush1.bf16.msra.mxu1 %v3082_v7 }
 0x1a6   : > { %2813 = vrot.lane.b32.xlu0 %v2812_v6, %s3104_s17  ;;  %v2583_v9 = vpop.f32.mrb[4].mxu0  ;;  %2585 = vmatprep.subr.bf16.mxu1 %v3109_v12 }
 0x1a7   : > { %v1135_v11 = vmul.f32 %v2583_v9, %v3431_v17  ;;  %v1107_v14 = vpop.f32.mrb[5].mxu0 }
 0x1a8   : > { %v1133_v18 = vmul.f32 %v3431_v17, %v1107_v14  ;;  %v2584_v22 = vpop.f32.mrb[6].mxu0 }
 0x1a9   : > { %v1150_v63 = vadd.f32 %v3436_v21, %v1135_v11  ;;  %v1136_v23 = vmul.f32 %v2584_v22, %v3431_v17  ;;  %2818 = vrot.lane.b32.xlu1 %v2817_v15, %s3112_s14  ;;  %v1110_v24 = vpop.f32.mrb[7].mxu0 }
 0x1aa   : > { %2823 = vrot.lane.b32.xlu0 %v2822_v16, %s3113_s18  ;;  %v1148_v1 = vadd.f32 %v3436_v21, %v1133_v18  ;;  %v1134_v25 = vmul.f32 %v3431_v17, %v1110_v24 }
 0x1ab   : > { %vm1158_vm1 = vcmp.ge.f32.partialorder %v1150_v63, 0.0  ;;  %v1166_v33 = vmul.f32 0.2, %v1150_v63  ;;  %v1151_v26 = vadd.f32 %v3436_v21, %v1136_v23 }
 0x1ac   : > { %vm1156_vm3 = vcmp.ge.f32.partialorder %v1148_v1, 0.0  ;;  %v1164_v28 = vmul.f32 0.2, %v1148_v1  ;;  %v1149_v29 = vadd.f32 %v3436_v21, %v1134_v25 }
 0x1ad   : > { %v1174_v30 = vsel %vm1158_vm1, %v1150_v63, %v1166_v33  ;;  %vm1159_vm4 = vcmp.ge.f32.partialorder %v1151_v26, 0.0  ;;  %v1167_v36 = vmul.f32 0.2, %v1151_v26  ;;  %2828 = vrot.lane.b32.xlu1 %v2827_v47, %s3108_s30 }
 0x1ae   : > { %2833 = vrot.lane.b32.xlu0 %v2832_v27, %s3114_s19  ;;  %v1182_v17 = vmul.f32 1.4142135, %v1174_v30  ;;  %v1172_v38 = vsel %vm1156_vm3, %v1148_v1, %v1164_v28  ;;  %vm1157_vm5 = vcmp.ge.f32.partialorder %v1149_v29, 0.0  ;;  %v1165_v39 = vmul.f32 0.2, %v1149_v29 }
 0x1af   : > { %v1180_v40 = vmul.f32 1.4142135, %v1172_v38  ;;  %v1175_v41 = vsel %vm1159_vm4, %v1151_v26, %v1167_v36 }
 0x1b0   : > { %v1197_v43 = vmul.f32 %v3450_v37, %v1182_v17  ;;  %v1183_v21 = vmul.f32 1.4142135, %v1175_v41  ;;  %v1173_v44 = vsel %vm1157_vm5, %v1149_v29, %v1165_v39 }
 0x1b1   : > { %v1195_v45 = vmul.f32 %v3450_v37, %v1180_v40  ;;  %v1181_v46 = vmul.f32 1.4142135, %v1173_v44  ;;  %2838 = vrot.lane.b32.xlu1 %v2832_v27, %s3111_s24 }
 0x1b2   : > { %2843 = vrot.lane.b32.xlu0 %v2842_v42, %s3110_s21  ;;  %1205 = vst.msk [vmem:[#allocation2 + $0x71] sm:$0xff] %vm526_vm0, %v1197_v43  ;;  %v1198_v48 = vmul.f32 %v3450_v37, %v1183_v21 }
 0x1b3   : > { %1203 = vst.msk [vmem:[#allocation2 + $0x51] sm:$0xff] %vm526_vm0, %v1195_v45  ;;  %v1196_v49 = vmul.f32 %v3450_v37, %v1181_v46 }
 0x1b4   : > { %1206 = vst.msk [vmem:[#allocation2 + $0x81] sm:$0xff] %vm526_vm0, %v1198_v48 }
 0x1b5   : > { %1204 = vst.msk [vmem:[#allocation2 + $0x61] sm:$0xff] %vm526_vm0, %v1196_v49 }
 0x1b9   : > { %v1245_v35 = vld [vmem:[#allocation2 + $0x71] sm:$0xff] }
 0x1ba   : > { %v1266_v50 = vld [vmem:[#allocation2 + $0x51] sm:$0xff] }
 0x1bb   : > { %v3541_v51 = vld [vmem:[#allocation2 + $0x50] sm:$0xff]  ;;  %v2852_v52 = vpack.i.bf16 %v1266_v50, %v3474_v57  ;;  %v1246_v32 = vld [vmem:[#allocation2 + $0x81] sm:$0xff] }
 0x1bc   : > { %v2847_v34 = vpack.i.bf16 %v3541_v51, %v3476_v58  ;;  %v3546_v53 = vld [vmem:[#allocation2 + $0x52] sm:$0xff]  ;;  %v1238_v54 = vld [vmem:[#allocation2 + $0x80] sm:$0xff]  ;;  %v2872_v56 = vpack.i.bf16 %v1246_v32, %v1245_v35  ;;  %v2922_v15 = vpack.i.bf16 %v3322_v13, %v1246_v32 }
 0x1bd   : > { %2853 = vrot.lane.b32.xlu1 %v2852_v52, %s3114_s19  ;;  %v2862_v37 = vpack.i.bf16 %v3546_v53, %v3494_v2  ;;  %v3554_v55 = vld [vmem:[#allocation2 + $0x70] sm:$0xff]  ;;  %v1244_v59 = vld [vmem:[#allocation2 + $0x61] sm:$0xff]  ;;  %v2917_v14 = vpack.i.bf16 %v3315_v10, %v1238_v54 }
 0x1be   : > { %2848 = vrot.lane.b32.xlu0 %v2847_v34, %s3108_s30  ;;  %v2867_v57 = vpack.i.bf16 %v1238_v54, %v3554_v55  ;;  %v3557_v19 = vld [vmem:[#allocation2 + $0x60] sm:$0xff]  ;;  %v2882_v20 = vpack.i.bf16 %v1244_v59, %v1266_v50  ;;  %v2897_v6 = vpack.i.bf16 %v1245_v35, %v1244_v59  ;;  %v3577_v8 = vld [vmem:[#allocation2 + $0x72] sm:$0xff] }
 0x1bf   : > { %v2877_v61 = vpack.i.bf16 %v3557_v19, %v3541_v51  ;;  %v3563_v62 = vld [vmem:[#allocation2 + $0x62] sm:$0xff]  ;;  %v2892_v0 = vpack.i.bf16 %v3554_v55, %v3557_v19 }
 0x1c0   : > { %v2887_v5 = vpack.i.bf16 %v3563_v62, %v3546_v53  ;;  %v3573_v7 = vld [vmem:[#allocation2 + $0x82] sm:$0xff]  ;;  %v2912_v9 = vpack.i.bf16 %v3577_v8, %v3563_v62 }
 0x1c1   : > { %2863 = vrot.lane.b32.xlu1 %v2862_v37, %s3110_s21  ;;  %v2907_v11 = vpack.i.bf16 %v3573_v7, %v3577_v8 }
 0x1c2   : > { %2858 = vrot.lane.b32.xlu0 %v2852_v52, %s3111_s24 }
 0x1c5   : > { %2868 = vrot.lane.b32.xlu1 %v2867_v57, %s3104_s17 }
 0x1c6   : > { %2873 = vrot.lane.b32.xlu0 %v2872_v56, %s3112_s14 }
 0x1c9   : > { %2883 = vrot.lane.b32.xlu1 %v2882_v20, %s3112_s14 }
 0x1ca   : > { %2878 = vrot.lane.b32.xlu0 %v2877_v61, %s3104_s17 }
 0x1cd   : > { %2893 = vrot.lane.b32.xlu1 %v2892_v0, %s3108_s30 }
 0x1ce   : > { %2888 = vrot.lane.b32.xlu0 %v2887_v5, %s3113_s18 }
 0x1d1   : > { %2903 = vrot.lane.b32.xlu1 %v2897_v6, %s3111_s24 }
 0x1d2   : > { %2898 = vrot.lane.b32.xlu0 %v2897_v6, %s3114_s19  ;;  %v1566_v6 = vpack.c.bf16 %v3546_v53, %v3494_v2 }
 0x1d5   : > { %2908 = vrot.lane.b32.xlu1 %v2907_v11, %s3113_s18 }
 0x1d6   : > { %2913 = vrot.lane.b32.xlu0 %v2912_v9, %s3110_s21 }
 0x1d9   : > { %2923 = vrot.lane.b32.xlu1 %v2922_v15, %s3114_s19 }
 0x1da   : > { %2918 = vrot.lane.b32.xlu0 %v2917_v14, %s3108_s30 }
 0x20f   : > { %v2794_v16 = vpop.permute.xlu1 %2793 }
 0x210   : > { %v2789_v18 = vpop.permute.xlu0 %2788  ;;  %v2796_v47 = vunpack.i.h.bf16 %v2794_v16  ;;  %v2795_v33 = vunpack.i.l.bf16 %v2794_v16 }
 0x211   : > { %v2791_v23 = vunpack.i.h.bf16 %v2789_v18  ;;  %v2790_v24 = vunpack.i.l.bf16 %v2789_v18 }
 0x213   : > { %v2799_v63 = vpop.permute.xlu1 %2798  ;;  %v1503_v10 = vsel %vm526_vm0, %v3331_v31, %v2790_v24  ;;  %v1504_v13 = vsel %vm526_vm0, %v3501_v4, %v2791_v23 }
 0x214   : > { %v3589_v22 = vpop.permute.xlu0 %2803  ;;  %v1512_v30 = vsel %vm1511_vm7, %v1503_v10, %v2795_v33  ;;  %v1513_v36 = vsel %vm1511_vm7, %v1504_v13, %v2796_v47  ;;  %v2801_v14 = vunpack.i.h.bf16 %v2799_v63  ;;  %v2800_v15 = vunpack.i.l.bf16 %v2799_v63 }
 0x217   : > { %v3591_v1 = vpop.permute.xlu1 %2808 }
 0x218   : > { %v2814_v25 = vpop.permute.xlu0 %2813  ;;  %v2811_v53 = vunpack.i.h.bf16 %v3591_v1  ;;  %v2810_v24 = vunpack.i.l.bf16 %v3591_v1 }
 0x219   : > { %v2816_v26 = vunpack.i.h.bf16 %v2814_v25  ;;  %v2815_v27 = vunpack.i.l.bf16 %v2814_v25 }
 0x21b   : > { %v2819_v28 = vpop.permute.xlu1 %2818  ;;  %v1521_v39 = vsel %vm936_vm6, %v1513_v36, %v2816_v26  ;;  %v1520_v40 = vsel %vm936_vm6, %v1512_v30, %v2815_v27 }
 0x21c   : > { %v2824_v29 = vpop.permute.xlu0 %2823  ;;  %v2821_v17 = vunpack.i.h.bf16 %v2819_v28  ;;  %v2820_v38 = vunpack.i.l.bf16 %v2819_v28 }
 0x21d   : > { %v2826_v41 = vunpack.i.h.bf16 %v2824_v29  ;;  %v2825_v31 = vunpack.i.l.bf16 %v2824_v29 }
 0x21e   : > { %v1529_v42 = vsel %vm1528_vm8, %v1520_v40, %v2820_v38  ;;  %v1530_v4 = vsel %vm1528_vm8, %v1521_v39, %v2821_v17  ;;  %v1568_v40 = vpack.c.bf16 %v3577_v8, %v3563_v62 }
 0x21f   : > { %v2829_v43 = vpop.permute.xlu1 %2828  ;;  %v1538_v49 = vsel %vm1537_vm9, %v1529_v42, %v2825_v31  ;;  %v1539_v50 = vsel %vm1537_vm9, %v1530_v4, %v2826_v41 }
 0x220   : > { %v2834_v21 = vpop.permute.xlu0 %2833  ;;  %v2831_v44 = vunpack.i.h.bf16 %v2829_v43  ;;  %v2830_v45 = vunpack.i.l.bf16 %v2829_v43 }
 0x221   : > { %v2836_v46 = vunpack.i.h.bf16 %v2834_v21  ;;  %v2835_v48 = vunpack.i.l.bf16 %v2834_v21 }
 0x222   : > { %v1546_v52 = vsel %vm972_vm10, %v1538_v49, %v2830_v45  ;;  %v1547_v34 = vsel %vm972_vm10, %v1539_v50, %v2831_v44 }
 0x223   : > { %v2839_v32 = vpop.permute.xlu1 %2838  ;;  %v1555_v54 = vsel %vm1554_vm11, %v1546_v52, %v2835_v48  ;;  %v1556_v35 = vsel %vm1554_vm11, %v1547_v34, %v2836_v46 }
 0x224   : > { %v2844_v37 = vpop.permute.xlu0 %2843  ;;  %v2841_v59 = vunpack.i.h.bf16 %v2839_v32  ;;  %v2840_v20 = vunpack.i.l.bf16 %v2839_v32  ;;  %v1563_v61 = vpack.c.bf16 %v1556_v35, %v1555_v54 }
 0x225   : > { %v2846_v56 = vunpack.i.h.bf16 %v2844_v37  ;;  %v2845_v57 = vunpack.i.l.bf16 %v2844_v37 }
 0x226   : > { %v1506_v0 = vsel %vm526_vm0, %v3485_v60, %v2841_v59  ;;  %v1505_v5 = vsel %vm526_vm0, %v3496_v3, %v2840_v20  ;;  %1688 = vmatmul.mubr.bf16.vlgmr.msra.gmra.mrb[0].mxu1 %v1563_v61  ;;  %v2806_v60 = vunpack.i.h.bf16 %v3589_v22  ;;  %v2805_v3 = vunpack.i.l.bf16 %v3589_v22 }
 0x227   : > { %v1515_v9 = vsel %vm1511_vm7, %v1506_v0, %v2846_v56  ;;  %v1514_v11 = vsel %vm1511_vm7, %v1505_v5, %v2845_v57  ;;  %2527 = vmatprep.mubr.msk.bf16.mxu1 %vm526_vm0, %v1566_v6 }
 0x228   : > { %v1523_v16 = vsel %vm936_vm6, %v1515_v9, %v2801_v14  ;;  %v1522_v18 = vsel %vm936_vm6, %v1514_v11, %v2800_v15 }
 0x229   : > { %v1531_v23 = vsel %vm1528_vm8, %v1522_v18, %v2805_v3  ;;  %v1532_v2 = vsel %vm1528_vm8, %v1523_v16, %v2806_v60  ;;  %v3651_v16 = vld [vmem:[#allocation2 + $0x92] sm:$0xff] }
 0x22a   : > { %v1540_v26 = vsel %vm1537_vm9, %v1531_v23, %v2810_v24  ;;  %v1541_v27 = vsel %vm1537_vm9, %v1532_v2, %v2811_v53 }
 0x22f   : > { %v2854_v25 = vpop.permute.xlu1 %2853 }
 0x230   : > { %v2849_v47 = vpop.permute.xlu0 %2848  ;;  %v2856_v33 = vunpack.i.h.bf16 %v2854_v25  ;;  %v2855_v63 = vunpack.i.l.bf16 %v2854_v25  ;;  %v1570_v25 = vpack.c.bf16 %v3651_v16, %v3573_v7 }
 0x231   : > { %v2851_v10 = vunpack.i.h.bf16 %v2849_v47  ;;  %v2850_v13 = vunpack.i.l.bf16 %v2849_v47 }
 0x233   : > { %v1549_v22 = vsel %vm972_vm10, %v1541_v27, %v2851_v10  ;;  %v1548_v28 = vsel %vm972_vm10, %v1540_v26, %v2850_v13  ;;  %v2864_v29 = vpop.permute.xlu1 %2863 }
 0x234   : > { %v2859_v30 = vpop.permute.xlu0 %2858  ;;  %v1557_v36 = vsel %vm1554_vm11, %v1548_v28, %v2855_v63  ;;  %v1558_v1 = vsel %vm1554_vm11, %v1549_v22, %v2856_v33  ;;  %v2866_v42 = vunpack.i.h.bf16 %v2864_v29  ;;  %v2865_v4 = vunpack.i.l.bf16 %v2864_v29 }
 0x235   : > { %v1565_v17 = vpack.c.bf16 %v1558_v1, %v1557_v36  ;;  %v2861_v38 = vunpack.i.h.bf16 %v2859_v30  ;;  %v2860_v39 = vunpack.i.l.bf16 %v2859_v30 }
 0x237   : > { %1696 = vmatmul.mubr.bf16.gmra.mrb[4].mxu1 %v1565_v17  ;;  %v2869_v31 = vpop.permute.xlu1 %2868  ;;  %v1507_v43 = vsel %vm526_vm0, %v3476_v58, %v2860_v39  ;;  %v1508_v21 = vsel %vm526_vm0, %v3541_v51, %v2861_v38 }
 0x238   : > { %v3634_v41 = vpop.permute.xlu0 %2873  ;;  %2528 = vmatprep.mubr.msk.bf16.mxu1 %vm526_vm0, %v1568_v40  ;;  %v1516_v8 = vsel %vm1511_vm7, %v1507_v43, %v2865_v4  ;;  %v1517_v50 = vsel %vm1511_vm7, %v1508_v21, %v2866_v42  ;;  %v2871_v47 = vunpack.i.h.bf16 %v2869_v31  ;;  %v2870_v33 = vunpack.i.l.bf16 %v2869_v31 }
 0x239   : > { %v2876_v13 = vunpack.i.h.bf16 %v3634_v41  ;;  %v2875_v26 = vunpack.i.l.bf16 %v3634_v41 }
 0x23b   : > { %v2884_v44 = vpop.permute.xlu1 %2883 }
 0x23c   : > { %v2879_v45 = vpop.permute.xlu0 %2878  ;;  %v2886_v49 = vunpack.i.h.bf16 %v2884_v44  ;;  %v2885_v62 = vunpack.i.l.bf16 %v2884_v44 }
 0x23d   : > { %v2881_v46 = vunpack.i.h.bf16 %v2879_v45  ;;  %v2880_v48 = vunpack.i.l.bf16 %v2879_v45  ;;  %v3083_v45 = vld [vmem:[%s3963_s3] sm:$0xff]  }
 0x23e   : > { %2250 = vmatpush1.bf16.msra.mxu0 %v3083_v45  ;;  %2594 = vmatpush1.bf16.msra.mxu1 %v3083_v45 }
 0x23f   : > { %v1525_v52 = vsel %vm936_vm6, %v1517_v50, %v2881_v46  ;;  %v1524_v34 = vsel %vm936_vm6, %v1516_v8, %v2880_v48  ;;  %v2894_v37 = vpop.permute.xlu1 %2893  ;;  %v3084_v46 = vld [vmem:[%s3963_s3 + $0x8] sm:$0xff]   ;;  %2251 = vmatprep.subr.bf16.mxu0 %v3109_v12  ;;  %2586 = vmatprep.subr.bf16.mxu1 %v3109_v12  ;;  %v3085_v48 = vld [vmem:[%s3963_s3 + $0x10] sm:$0xff]   ;;  %v3705_v50 = vld [vmem:[%s3971_s11] ss:$0 sm:$0xff] }
 0x240   : > { %v2889_v32 = vpop.permute.xlu0 %2888  ;;  %v2896_v35 = vunpack.i.h.bf16 %v2894_v37  ;;  %v2895_v51 = vunpack.i.l.bf16 %v2894_v37  ;;  %v1533_v56 = vsel %vm1528_vm8, %v1524_v34, %v2885_v62  ;;  %v1534_v57 = vsel %vm1528_vm8, %v1525_v52, %v2886_v49  ;;  %v3086_v49 = vld [vmem:[%s3963_s3 + $0x18] sm:$0xff]   ;;  %v3700_v62 = vld [vmem:[%s516_s22] ss:$0 sm:$0xff] }
 0x241   : > { %v2891_v58 = vunpack.i.h.bf16 %v2889_v32  ;;  %v2890_v54 = vunpack.i.l.bf16 %v2889_v32 }
 0x242   : > { %2252 = vmatpush1.bf16.msra.mxu0 %v3084_v46  ;;  %2595 = vmatpush1.bf16.msra.mxu1 %v3084_v46 }
 0x243   : > { %v1542_v59 = vsel %vm1537_vm9, %v1533_v56, %v2890_v54  ;;  %v1543_v20 = vsel %vm1537_vm9, %v1534_v57, %v2891_v58  ;;  %v2904_v0 = vpop.permute.xlu1 %2903  ;;  %2253 = vmatprep.subr.bf16.mxu0 %v3109_v12  ;;  %2587 = vmatprep.subr.bf16.mxu1 %v3109_v12  ;;  %v3715_v57 = vld [vmem:[%s510_s27] ss:$0 sm:$0xff] }
 0x244   : > { %v2899_v61 = vpop.permute.xlu0 %2898  ;;  %v2906_v9 = vunpack.i.h.bf16 %v2904_v0  ;;  %v2905_v11 = vunpack.i.l.bf16 %v2904_v0  ;;  %v1550_v14 = vsel %vm972_vm10, %v1542_v59, %v2895_v51  ;;  %v1551_v15 = vsel %vm972_vm10, %v1543_v20, %v2896_v35 }
 0x245   : > { %v2901_v5 = vunpack.i.h.bf16 %v2899_v61  ;;  %v2900_v6 = vunpack.i.l.bf16 %v2899_v61 }
 0x246   : > { %v1510_v63 = vsel %vm526_vm0, %v3554_v55, %v2906_v9  ;;  %v1509_v10 = vsel %vm526_vm0, %v3557_v19, %v2905_v11  ;;  %2254 = vmatpush1.bf16.msra.mxu0 %v3085_v48  ;;  %2596 = vmatpush1.bf16.msra.mxu1 %v3085_v48  ;;  %v3087_v9 = vld [vmem:[%s3963_s3 + $0x20] sm:$0xff]  }
 0x247   : > { %v1559_v18 = vsel %vm1554_vm11, %v1550_v14, %v2900_v6  ;;  %v1560_v60 = vsel %vm1554_vm11, %v1551_v15, %v2901_v5  ;;  %v2909_v23 = vpop.permute.xlu1 %2908  ;;  %2255 = vmatprep.subr.bf16.mxu0 %v3109_v12  ;;  %2588 = vmatprep.subr.bf16.mxu1 %v3109_v12  ;;  %v3088_v14 = vld [vmem:[%s3963_s3 + $0x28] sm:$0xff]  }
 0x248   : > { %v2914_v3 = vpop.permute.xlu0 %2913  ;;  %v1567_v2 = vpack.c.bf16 %v1560_v60, %v1559_v18  ;;  %v2911_v29 = vunpack.i.h.bf16 %v2909_v23  ;;  %v2910_v55 = vunpack.i.l.bf16 %v2909_v23  ;;  %v1813_v60 = vld [vmem:[#allocation2 + $0x1] sm:$0xff] }
 0x249   : > { %v2916_v53 = vunpack.i.h.bf16 %v2914_v3  ;;  %v2915_v24 = vunpack.i.l.bf16 %v2914_v3  ;;  %v1821_v3 = vld [vmem:[#allocation2 + $0x2] sm:$0xff] }
 0x24a   : > { %1704 = vmatmul.mubr.bf16.gmra.mrb[8].mxu1 %v1567_v2  ;;  %2256 = vmatpush1.bf16.msra.mxu0 %v3086_v49 }
 0x24b   : > { %v1518_v27 = vsel %vm1511_vm7, %v1509_v10, %v2915_v24  ;;  %v1519_v22 = vsel %vm1511_vm7, %v1510_v63, %v2916_v53  ;;  %2529 = vmatprep.mubr.msk.bf16.mxu1 %vm526_vm0, %v1570_v25  ;;  %v2924_v36 = vpop.permute.xlu1 %2923  ;;  %2597 = vmatpush1.bf16.msra.mxu1 %v3086_v49  ;;  %v3089_v10 = vld [vmem:[%s3963_s3 + $0x30] sm:$0xff]  }
 0x24c   : > { %v1526_v7 = vsel %vm936_vm6, %v1518_v27, %v2870_v33  ;;  %v1527_v28 = vsel %vm936_vm6, %v1519_v22, %v2871_v47  ;;  %v2919_v30 = vpop.permute.xlu0 %2918  ;;  %v2926_v41 = vunpack.i.h.bf16 %v2924_v36  ;;  %v2925_v31 = vunpack.i.l.bf16 %v2924_v36  ;;  %2257 = vmatprep.subr.bf16.mxu0 %v3109_v12  ;;  %2589 = vmatprep.subr.bf16.mxu1 %v3109_v12 }
 0x24d   : > { %v1535_v19 = vsel %vm1528_vm8, %v1526_v7, %v2875_v26  ;;  %v1536_v1 = vsel %vm1528_vm8, %v1527_v28, %v2876_v13  ;;  %v2921_v17 = vunpack.i.h.bf16 %v2919_v30  ;;  %v2920_v38 = vunpack.i.l.bf16 %v2919_v30 }
 0x24e   : > { %v1544_v39 = vsel %vm1537_vm9, %v1535_v19, %v2910_v55  ;;  %v1545_v40 = vsel %vm1537_vm9, %v1536_v1, %v2911_v29  ;;  %2258 = vmatpush1.bf16.msra.mxu0 %v3087_v9  ;;  %v3090_v55 = vld [vmem:[%s3963_s3 + $0x38] sm:$0xff]  }
 0x24f   : > { %v1552_v42 = vsel %vm972_vm10, %v1544_v39, %v2920_v38  ;;  %v1553_v4 = vsel %vm972_vm10, %v1545_v40, %v2921_v17  ;;  %2598 = vmatpush1.bf16.msra.mxu1 %v3087_v9  ;;  %2259 = vmatprep.subr.bf16.mxu0 %v3109_v12 }
 0x250   : > { %v1561_v43 = vsel %vm1554_vm11, %v1552_v42, %v2925_v31  ;;  %v1562_v21 = vsel %vm1554_vm11, %v1553_v4, %v2926_v41  ;;  %2590 = vmatprep.subr.bf16.mxu1 %v3109_v12  ;;  %v3091_v31 = vld [vmem:[%s3963_s3 + $0x40] sm:$0xff]  }
 0x251   : > { %v1569_v44 = vpack.c.bf16 %v1562_v21, %v1561_v43 }
 0x252   : > { %2260 = vmatpush1.bf16.msra.mxu0 %v3088_v14 }
 0x253   : > { %1712 = vmatmul.mubr.bf16.gmra.mrb[12].mxu1 %v1569_v44  ;;  %2261 = vmatprep.subr.bf16.mxu0 %v3109_v12 }
 0x254   : > { %2599 = vmatpush1.bf16.msra.mxu1 %v3088_v14 }
 0x255   : > { %2591 = vmatprep.subr.bf16.mxu1 %v3109_v12 }
 0x256   : > { %2262 = vmatpush1.bf16.msra.mxu0 %v3089_v10 }
 0x257   : > { %2263 = vmatprep.subr.bf16.mxu0 %v3109_v12 }
 0x258   : > { %2600 = vmatpush1.bf16.msra.mxu1 %v3089_v10 }
 0x259   : > { %2592 = vmatprep.subr.bf16.mxu1 %v3109_v12 }
 0x25a   : > { %2264 = vmatpush1.bf16.msra.mxu0 %v3090_v55 }
 0x25b   : > { %2265 = vmatprep.subr.bf16.mxu0 %v3109_v12 }
 0x25c   : > { %2601 = vmatpush1.bf16.msra.mxu1 %v3090_v55 }
 0x25d   : > { %2593 = vmatprep.subr.bf16.mxu1 %v3109_v12 }
 0x25e   : > { %2266 = vmatpush1.bf16.msra.mxu0 %v3091_v31 }
 0x260   : > { %2602 = vmatpush1.bf16.msra.mxu1 %v3091_v31 }
 0x2f9   : > { %v1689_v8 = vpop.f32.mrb[0].mxu1 }
 0x2fa   : > { %v1727_v52 = vmul.f32 %v3700_v62, %v1689_v8  ;;  %v1691_v34 = vpop.f32.mrb[1].mxu1 }
 0x2fb   : > { %v1692_v37 = vpop.f32.mrb[2].mxu1 }
 0x2fc   : > { %v1742_v32 = vadd.f32 %v3705_v50, %v1727_v52  ;;  %v1728_v58 = vmul.f32 %v3700_v62, %v1692_v37  ;;  %v1694_v54 = vpop.f32.mrb[3].mxu1 }
 0x2fe   : > { %vm1750_vm12 = vcmp.ge.f32.partialorder %v1742_v32, 0.0  ;;  %v1758_v35 = vmul.f32 0.2, %v1742_v32  ;;  %v1743_v51 = vadd.f32 %v3705_v50, %v1728_v58 }
 0x300   : > { %v1766_v56 = vsel %vm1750_vm12, %v1742_v32, %v1758_v35  ;;  %vm1751_vm13 = vcmp.ge.f32.partialorder %v1743_v51, 0.0  ;;  %v1759_v59 = vmul.f32 0.2, %v1743_v51 }
 0x301   : > { %v1774_v20 = vmul.f32 1.4142135, %v1766_v56 }
 0x302   : > { %v1767_v61 = vsel %vm1751_vm13, %v1743_v51, %v1759_v59 }
 0x303   : > { %v1789_v0 = vmul.f32 %v3715_v57, %v1774_v20  ;;  %v1775_v5 = vmul.f32 1.4142135, %v1767_v61 }
 0x305   : > { %1797 = vst.msk [vmem:[#allocation2 + $0x11] sm:$0xff] %vm526_vm0, %v1789_v0  ;;  %v1790_v6 = vmul.f32 %v3715_v57, %v1775_v5 }
 0x307   : > { %1798 = vst.msk [vmem:[#allocation2 + $0x21] sm:$0xff] %vm526_vm0, %v1790_v6 }
 0x30a   : > { %v1697_v11 = vpop.f32.mrb[4].mxu1 }
 0x30b   : > { %v1729_v15 = vmul.f32 %v3700_v62, %v1697_v11  ;;  %v1699_v18 = vpop.f32.mrb[5].mxu1 }
 0x30c   : > { %v1700_v23 = vpop.f32.mrb[6].mxu1  ;;  %v1814_v25 = vld [vmem:[#allocation2 + $0x11] sm:$0xff] }
 0x30d   : > { %v1744_v2 = vadd.f32 %v3705_v50, %v1729_v15  ;;  %v1730_v53 = vmul.f32 %v3700_v62, %v1700_v23  ;;  %v1702_v24 = vpop.f32.mrb[7].mxu1  ;;  %v1822_v47 = vld [vmem:[#allocation2 + $0x12] sm:$0xff]  ;;  %v2927_v33 = vpack.i.bf16 %v1814_v25, %v1813_v60 }
 0x30e   : > { %v2932_v63 = vpack.i.bf16 %v1822_v47, %v1821_v3  ;;  %v3738_v27 = vld [vmem:[#allocation2 + $0x20] sm:$0xff]  ;;  %v3742_v29 = vld [vmem:[#allocation2 + $0x10] sm:$0xff] }
 0x30f   : > { %vm1752_vm14 = vcmp.ge.f32.partialorder %v1744_v2, 0.0  ;;  %v1760_v13 = vmul.f32 0.2, %v1744_v2  ;;  %v1745_v26 = vadd.f32 %v3705_v50, %v1730_v53  ;;  %v1838_v22 = vld [vmem:[#allocation2 + $0x21] sm:$0xff]  ;;  %2928 = vrot.lane.b32.xlu0 %v2927_v33, %s3111_s24  ;;  %v2937_v36 = vpack.i.bf16 %v3738_v27, %v3742_v29 }
 0x310   : > { %2933 = vrot.lane.b32.xlu1 %v2932_v63, %s3110_s21  ;;  %v2942_v19 = vpack.i.bf16 %v1838_v22, %v1814_v25  ;;  %v1846_v17 = vld [vmem:[#allocation2 + $0x22] sm:$0xff] }
 0x311   : > { %v1768_v7 = vsel %vm1752_vm14, %v1744_v2, %v1760_v13  ;;  %vm1753_vm15 = vcmp.ge.f32.partialorder %v1745_v26, 0.0  ;;  %v1761_v28 = vmul.f32 0.2, %v1745_v26  ;;  %v2947_v41 = vpack.i.bf16 %v1846_v17, %v1822_v47 }
 0x312   : > { %v1776_v30 = vmul.f32 1.4142135, %v1768_v7 }
 0x313   : > { %v1769_v1 = vsel %vm1753_vm15, %v1745_v26, %v1761_v28  ;;  %2938 = vrot.lane.b32.xlu0 %v2937_v36, %s3104_s17 }
 0x314   : > { %v1791_v38 = vmul.f32 %v3715_v57, %v1776_v30  ;;  %v1777_v39 = vmul.f32 1.4142135, %v1769_v1  ;;  %2943 = vrot.lane.b32.xlu1 %v2942_v19, %s3112_s14 }
 0x316   : > { %1799 = vst.msk [vmem:[#allocation2 + $0x31] sm:$0xff] %vm526_vm0, %v1791_v38  ;;  %v1792_v40 = vmul.f32 %v3715_v57, %v1777_v39 }
 0x317   : > { %2948 = vrot.lane.b32.xlu0 %v2947_v41, %s3113_s18 }
 0x318   : > { %1800 = vst.msk [vmem:[#allocation2 + $0x41] sm:$0xff] %vm526_vm0, %v1792_v40 }
 0x31d   : > { %v1705_v42 = vpop.f32.mrb[8].mxu1  ;;  %v1870_v21 = vld [vmem:[#allocation2 + $0x32] sm:$0xff] }
 0x31e   : > { %v1731_v4 = vmul.f32 %v3700_v62, %v1705_v42  ;;  %v1707_v43 = vpop.f32.mrb[9].mxu1  ;;  %v1862_v44 = vld [vmem:[#allocation2 + $0x31] sm:$0xff]  ;;  %v2158_v48 = vpack.c.bf16 %v1870_v21, %v1846_v17  ;;  %v2967_v58 = vpack.i.bf16 %v1870_v21, %v1846_v17 }
 0x31f   : > { %v3764_v45 = vld [vmem:[#allocation2 + $0x30] sm:$0xff]  ;;  %v1708_v46 = vpop.f32.mrb[10].mxu1  ;;  %v2957_v49 = vpack.i.bf16 %v1862_v44, %v1838_v22  ;;  %v1840_v51 = vld [vmem:[#allocation2 + $0x41] sm:$0xff] }
 0x320   : > { %v2952_v12 = vpack.i.bf16 %v3764_v45, %v3738_v27  ;;  %v1746_v8 = vadd.f32 %v3705_v50, %v1731_v4  ;;  %v1732_v52 = vmul.f32 %v3700_v62, %v1708_v46  ;;  %v1710_v34 = vpop.f32.mrb[11].mxu1  ;;  %2542 = vmatprep.mubr.msk.bf16.mxu0 %vm526_vm0, %v2158_v48  ;;  %v3775_v59 = vld [vmem:[#allocation2 + $0x40] sm:$0xff]  ;;  %v2977_v11 = vpack.i.bf16 %v1840_v51, %v1862_v44 }
 0x321   : > { %2958 = vrot.lane.b32.xlu0 %v2957_v49, %s3114_s19  ;;  %v2972_v14 = vpack.i.bf16 %v3775_v59, %v3764_v45  ;;  %v3787_v2 = vld [vmem:[#allocation2 + $0x42] sm:$0xff] }
 0x322   : > { %vm1754_vm1 = vcmp.ge.f32.partialorder %v1746_v8, 0.0  ;;  %v1762_v37 = vmul.f32 0.2, %v1746_v8  ;;  %v1747_v32 = vadd.f32 %v3705_v50, %v1732_v52  ;;  %2953 = vrot.lane.b32.xlu1 %v2952_v12, %s3108_s30  ;;  %v2982_v25 = vpack.i.bf16 %v3787_v2, %v1870_v21  ;;  %v1860_v52 = vld [vmem:[#allocation2 + $0x90] sm:$0xff] }
 0x324   : > { %v1770_v54 = vsel %vm1754_vm1, %v1746_v8, %v1762_v37  ;;  %vm1755_vm3 = vcmp.ge.f32.partialorder %v1747_v32, 0.0  ;;  %v1763_v35 = vmul.f32 0.2, %v1747_v32  ;;  %v1868_v37 = vld [vmem:[#allocation2 + $0x91] sm:$0xff] }
 0x325   : > { %v1778_v56 = vmul.f32 1.4142135, %v1770_v54  ;;  %2968 = vrot.lane.b32.xlu0 %v2967_v58, %s3110_s21 }
 0x326   : > { %v1771_v20 = vsel %vm1755_vm3, %v1747_v32, %v1763_v35  ;;  %2963 = vrot.lane.b32.xlu1 %v2957_v49, %s3111_s24  ;;  %v1713_v61 = vpop.f32.mrb[12].mxu1 }
 0x327   : > { %v1793_v0 = vmul.f32 %v3715_v57, %v1778_v56  ;;  %v1779_v5 = vmul.f32 1.4142135, %v1771_v20  ;;  %v1733_v6 = vmul.f32 %v3700_v62, %v1713_v61  ;;  %v1715_v9 = vpop.f32.mrb[13].mxu1  ;;  %v1805_v20 = vld [vmem:[#allocation2] sm:$0xff] }
 0x328   : > { %v1716_v15 = vpop.f32.mrb[14].mxu1 }
 0x329   : > { %1801 = vst.msk [vmem:[#allocation2 + $0x51] sm:$0xff] %vm526_vm0, %v1793_v0  ;;  %v1794_v18 = vmul.f32 %v3715_v57, %v1779_v5  ;;  %v1748_v60 = vadd.f32 %v3705_v50, %v1733_v6  ;;  %2978 = vrot.lane.b32.xlu0 %v2977_v11, %s3112_s14  ;;  %v1734_v3 = vmul.f32 %v3700_v62, %v1716_v15  ;;  %v1718_v23 = vpop.f32.mrb[15].mxu1 }
 0x32a   : > { %2973 = vrot.lane.b32.xlu1 %v2972_v14, %s3104_s17 }
 0x32b   : > { %1802 = vst.msk [vmem:[#allocation2 + $0x61] sm:$0xff] %vm526_vm0, %v1794_v18  ;;  %vm1756_vm4 = vcmp.ge.f32.partialorder %v1748_v60, 0.0  ;;  %v1764_v53 = vmul.f32 0.2, %v1748_v60  ;;  %v1749_v24 = vadd.f32 %v3705_v50, %v1734_v3 }
 0x32d   : > { %v1772_v47 = vsel %vm1756_vm4, %v1748_v60, %v1764_v53  ;;  %vm1757_vm5 = vcmp.ge.f32.partialorder %v1749_v24, 0.0  ;;  %v1765_v33 = vmul.f32 0.2, %v1749_v24 }
 0x32e   : > { %v1780_v63 = vmul.f32 1.4142135, %v1772_v47  ;;  %2983 = vrot.lane.b32.xlu1 %v2982_v25, %s3113_s18 }
 0x32f   : > { %v1773_v62 = vsel %vm1757_vm5, %v1749_v24, %v1765_v33 }
 0x330   : > { %v1795_v10 = vmul.f32 %v3715_v57, %v1780_v63  ;;  %v1781_v13 = vmul.f32 1.4142135, %v1773_v62  ;;  %v3795_v26 = vld [vmem:[#allocation2 + $0x50] sm:$0xff] }
 0x331   : > { %v1864_v22 = vld [vmem:[#allocation2 + $0x51] sm:$0xff]  ;;  %v2987_v50 = vpack.i.bf16 %v3795_v26, %v3775_v59 }
 0x332   : > { %v3797_v7 = vld [vmem:[#allocation2 + $0x52] sm:$0xff]  ;;  %v2992_v28 = vpack.i.bf16 %v1864_v22, %v1840_v51  ;;  %1803 = vst.msk [vmem:[#allocation2 + $0x71] sm:$0xff] %vm526_vm0, %v1795_v10  ;;  %v1796_v30 = vmul.f32 %v3715_v57, %v1781_v13  ;;  %v1819_v36 = vld [vmem:[#allocation2 + $0x61] sm:$0xff] }
 0x333   : > { %v2160_v55 = vpack.c.bf16 %v3797_v7, %v3787_v2  ;;  %2988 = vrot.lane.b32.xlu0 %v2987_v50, %s3108_s30  ;;  %v3002_v19 = vpack.i.bf16 %v3797_v7, %v3787_v2  ;;  %v3811_v17 = vld [vmem:[#allocation2 + $0x62] sm:$0xff]  ;;  %v3012_v21 = vpack.i.bf16 %v1819_v36, %v1864_v22 }
 0x334   : > { %2993 = vrot.lane.b32.xlu1 %v2992_v28, %s3114_s19  ;;  %1804 = vst.msk [vmem:[#allocation2 + $0x81] sm:$0xff] %vm526_vm0, %v1796_v30  ;;  %v3815_v40 = vld [vmem:[#allocation2 + $0x60] sm:$0xff]  ;;  %v3017_v48 = vpack.i.bf16 %v3811_v17, %v3797_v7 }
 0x335   : > { %v3007_v42 = vpack.i.bf16 %v3815_v40, %v3795_v26 }
 0x337   : > { %2998 = vrot.lane.b32.xlu0 %v2992_v28, %s3111_s24 }
 0x339   : > { %v1820_v1 = vld [vmem:[#allocation2 + $0x71] sm:$0xff] }
 0x33a   : > { %v3813_v38 = vld [vmem:[#allocation2 + $0x72] sm:$0xff]  ;;  %v3022_v39 = vpack.i.bf16 %v1820_v1, %v1819_v36 }
 0x33b   : > { %v2162_v57 = vpack.c.bf16 %v3813_v38, %v3811_v17  ;;  %3003 = vrot.lane.b32.xlu0 %v3002_v19, %s3110_s21  ;;  %v1875_v41 = vld [vmem:[#allocation2 + $0x82] sm:$0xff]  ;;  %v3027_v4 = vpack.i.bf16 %v3813_v38, %v3811_v17  ;;  %v3829_v44 = vld [vmem:[#allocation2 + $0x70] sm:$0xff] }
 0x33c   : > { %3023 = vrot.lane.b32.xlu1 %v3022_v39, %s3111_s24  ;;  %v2164_v31 = vpack.c.bf16 %v3651_v16, %v1875_v41  ;;  %v1836_v43 = vld [vmem:[#allocation2 + $0x80] sm:$0xff]  ;;  %v3032_v12 = vpack.i.bf16 %v3829_v44, %v3815_v40  ;;  %v3047_v8 = vpack.i.bf16 %v1875_v41, %v3813_v38 }
 0x33d   : > { %v3037_v46 = vpack.i.bf16 %v1836_v43, %v3829_v44  ;;  %v1844_v16 = vld [vmem:[#allocation2 + $0x81] sm:$0xff]  ;;  %v3052_v34 = vpack.i.bf16 %v1860_v52, %v1836_v43 }
 0x33e   : > { %2545 = vmatprep.mubr.msk.bf16.mxu1 %vm526_vm0, %v2164_v31  ;;  %v3042_v49 = vpack.i.bf16 %v1844_v16, %v1820_v1  ;;  %v3062_v32 = vpack.i.bf16 %v1868_v37, %v1844_v16 }
 0x33f   : > { %3008 = vrot.lane.b32.xlu0 %v3007_v42, %s3104_s17 }
 0x340   : > { %3028 = vrot.lane.b32.xlu1 %v3027_v4, %s3110_s21  ;;  %s519_s21 = scalar_lea.vmem %s3969_s9, %s3976_s26 }
 0x343   : > { %3013 = vrot.lane.b32.xlu0 %v3012_v21, %s3112_s14 }
 0x344   : > { %3038 = vrot.lane.b32.xlu1 %v3037_v46, %s3104_s17 }
 0x347   : > { %3018 = vrot.lane.b32.xlu0 %v3017_v48, %s3113_s18 }
 0x348   : > { %3043 = vrot.lane.b32.xlu1 %v3042_v49, %s3112_s14 }
 0x34b   : > { %3033 = vrot.lane.b32.xlu0 %v3032_v12, %s3108_s30 }
 0x34c   : > { %3048 = vrot.lane.b32.xlu1 %v3047_v8, %s3113_s18 }
 0x34f   : > { %3058 = vrot.lane.b32.xlu0 %v3022_v39, %s3114_s19 }
 0x350   : > { %3053 = vrot.lane.b32.xlu1 %v3052_v34, %s3108_s30 }
 0x354   : > { %3063 = vrot.lane.b32.xlu1 %v3062_v32, %s3114_s19 }
 0x381   : > { %v2929_v58 = vpop.permute.xlu0 %2928 }
 0x382   : > { %v2934_v54 = vpop.permute.xlu1 %2933  ;;  %v2931_v51 = vunpack.i.h.bf16 %v2929_v58  ;;  %v2930_v56 = vunpack.i.l.bf16 %v2929_v58 }
 0x383   : > { %v2936_v61 = vunpack.i.h.bf16 %v2934_v54  ;;  %v2935_v0 = vunpack.i.l.bf16 %v2934_v54 }
 0x384   : > { %v2102_v5 = vsel %vm526_vm0, %v3742_v29, %v2931_v51  ;;  %v2101_v6 = vsel %vm526_vm0, %v1805_v20, %v2930_v56 }
 0x385   : > { %v2939_v35 = vpop.permute.xlu0 %2938  ;;  %v2110_v18 = vsel %vm1511_vm7, %v2102_v5, %v2936_v61  ;;  %v2109_v60 = vsel %vm1511_vm7, %v2101_v6, %v2935_v0 }
 0x386   : > { %v2941_v9 = vunpack.i.h.bf16 %v2939_v35  ;;  %v2940_v11 = vunpack.i.l.bf16 %v2939_v35  ;;  %v2944_v14 = vpop.permute.xlu1 %2943 }
 0x387   : > { %v2946_v3 = vunpack.i.h.bf16 %v2944_v14  ;;  %v2945_v23 = vunpack.i.l.bf16 %v2944_v14 }
 0x388   : > { %v2117_v53 = vsel %vm936_vm6, %v2109_v60, %v2940_v11  ;;  %v2118_v24 = vsel %vm936_vm6, %v2110_v18, %v2941_v9 }
 0x389   : > { %v2949_v15 = vpop.permute.xlu0 %2948  ;;  %v2125_v10 = vsel %vm1528_vm8, %v2117_v53, %v2945_v23  ;;  %v2126_v13 = vsel %vm1528_vm8, %v2118_v24, %v2946_v3 }
 0x38a   : > { %v2951_v25 = vunpack.i.h.bf16 %v2949_v15  ;;  %v2950_v47 = vunpack.i.l.bf16 %v2949_v15 }
 0x38c   : > { %v2133_v28 = vsel %vm1537_vm9, %v2125_v10, %v2950_v47  ;;  %v2134_v30 = vsel %vm1537_vm9, %v2126_v13, %v2951_v25 }
 0x393   : > { %v2959_v33 = vpop.permute.xlu0 %2958 }
 0x394   : > { %v2961_v29 = vunpack.i.h.bf16 %v2959_v33  ;;  %v2960_v63 = vunpack.i.l.bf16 %v2959_v33  ;;  %v2954_v62 = vpop.permute.xlu1 %2953 }
 0x395   : > { %v2956_v22 = vunpack.i.h.bf16 %v2954_v62  ;;  %v2955_v50 = vunpack.i.l.bf16 %v2954_v62 }
 0x397   : > { %v2141_v36 = vsel %vm972_vm10, %v2133_v28, %v2955_v50  ;;  %v2142_v19 = vsel %vm972_vm10, %v2134_v30, %v2956_v22  ;;  %v2969_v41 = vpop.permute.xlu0 %2968 }
 0x398   : > { %v2149_v1 = vsel %vm1554_vm11, %v2141_v36, %v2960_v63  ;;  %v2150_v39 = vsel %vm1554_vm11, %v2142_v19, %v2961_v29  ;;  %v2964_v31 = vpop.permute.xlu1 %2963  ;;  %v2971_v46 = vunpack.i.h.bf16 %v2969_v41  ;;  %v2970_v16 = vunpack.i.l.bf16 %v2969_v41 }
 0x399   : > { %v2157_v42 = vpack.c.bf16 %v2150_v39, %v2149_v1  ;;  %v2966_v4 = vunpack.i.h.bf16 %v2964_v31  ;;  %v2965_v43 = vunpack.i.l.bf16 %v2964_v31 }
 0x39b   : > { %2282 = vmatmul.mubr.bf16.vlgmr.msra.gmra.mrb[8].mxu0 %v2157_v42  ;;  %v2104_v48 = vsel %vm526_vm0, %v3764_v45, %v2966_v4  ;;  %v2103_v49 = vsel %vm526_vm0, %v3738_v27, %v2965_v43  ;;  %v2979_v12 = vpop.permute.xlu0 %2978 }
 0x39c   : > { %v2974_v21 = vpop.permute.xlu1 %2973  ;;  %2543 = vmatprep.mubr.msk.bf16.mxu0 %vm526_vm0, %v2160_v55  ;;  %v2981_v37 = vunpack.i.h.bf16 %v2979_v12  ;;  %v2980_v32 = vunpack.i.l.bf16 %v2979_v12  ;;  %v2111_v58 = vsel %vm1511_vm7, %v2103_v49, %v2970_v16  ;;  %v2112_v2 = vsel %vm1511_vm7, %v2104_v48, %v2971_v46 }
 0x39d   : > { %v2976_v8 = vunpack.i.h.bf16 %v2974_v21  ;;  %v2975_v52 = vunpack.i.l.bf16 %v2974_v21 }
 0x39f   : > { %v2119_v7 = vsel %vm936_vm6, %v2111_v58, %v2975_v52  ;;  %v2120_v55 = vsel %vm936_vm6, %v2112_v2, %v2976_v8 }
 0x3a0   : > { %v2984_v34 = vpop.permute.xlu1 %2983  ;;  %v2127_v45 = vsel %vm1528_vm8, %v2119_v7, %v2980_v32  ;;  %v2128_v27 = vsel %vm1528_vm8, %v2120_v55, %v2981_v37 }
 0x3a1   : > { %v2986_v54 = vunpack.i.h.bf16 %v2984_v34  ;;  %v2985_v35 = vunpack.i.l.bf16 %v2984_v34 }
 0x3a3   : > { %v2135_v6 = vsel %vm1537_vm9, %v2127_v45, %v2985_v35  ;;  %v2136_v9 = vsel %vm1537_vm9, %v2128_v27, %v2986_v54 }
 0x3a5   : > { %v2989_v51 = vpop.permute.xlu0 %2988 }
 0x3a6   : > { %v2994_v56 = vpop.permute.xlu1 %2993  ;;  %v2991_v20 = vunpack.i.h.bf16 %v2989_v51  ;;  %v2990_v61 = vunpack.i.l.bf16 %v2989_v51 }
 0x3a7   : > { %v2996_v0 = vunpack.i.h.bf16 %v2994_v56  ;;  %v2995_v5 = vunpack.i.l.bf16 %v2994_v56 }
 0x3a8   : > { %v2143_v11 = vsel %vm972_vm10, %v2135_v6, %v2990_v61  ;;  %v2144_v14 = vsel %vm972_vm10, %v2136_v9, %v2991_v20 }
 0x3a9   : > { %v2999_v15 = vpop.permute.xlu0 %2998  ;;  %v2151_v18 = vsel %vm1554_vm11, %v2143_v11, %v2995_v5  ;;  %v2152_v60 = vsel %vm1554_vm11, %v2144_v14, %v2996_v0 }
 0x3aa   : > { %v2159_v3 = vpack.c.bf16 %v2152_v60, %v2151_v18  ;;  %v3001_v29 = vunpack.i.h.bf16 %v2999_v15  ;;  %v3000_v63 = vunpack.i.l.bf16 %v2999_v15 }
 0x3ac   : > { %2290 = vmatmul.mubr.bf16.gmra.mrb[12].mxu0 %v2159_v3  ;;  %v2106_v17 = vsel %vm526_vm0, %v3795_v26, %v3001_v29  ;;  %v2105_v38 = vsel %vm526_vm0, %v3775_v59, %v3000_v63  ;;  %v2546_v63 = vld [vmem:[%s519_s21] ss:$0 sm:$0xff] }
 0x3ad   : > { %v3004_v23 = vpop.permute.xlu0 %3003  ;;  %2544 = vmatprep.mubr.msk.bf16.mxu0 %vm526_vm0, %v2162_v57 }
 0x3ae   : > { %v3024_v53 = vpop.permute.xlu1 %3023  ;;  %v3006_v62 = vunpack.i.h.bf16 %v3004_v23  ;;  %v3005_v10 = vunpack.i.l.bf16 %v3004_v23 }
 0x3af   : > { %v3026_v22 = vunpack.i.h.bf16 %v3024_v53  ;;  %v3025_v50 = vunpack.i.l.bf16 %v3024_v53 }
 0x3b0   : > { %v2113_v1 = vsel %vm1511_vm7, %v2105_v38, %v3005_v10  ;;  %v2114_v39 = vsel %vm1511_vm7, %v2106_v17, %v3006_v62  ;;  %v3924_v10 = vld [vmem:[%s3972_s12] ss:$0 sm:$0xff] }
 0x3b1   : > { %v3009_v24 = vpop.permute.xlu0 %3008  ;;  %v2107_v4 = vsel %vm526_vm0, %v3815_v40, %v3025_v50  ;;  %v2108_v43 = vsel %vm526_vm0, %v3829_v44, %v3026_v22 }
 0x3b2   : > { %v3029_v25 = vpop.permute.xlu1 %3028  ;;  %v3011_v30 = vunpack.i.h.bf16 %v3009_v24  ;;  %v3010_v36 = vunpack.i.l.bf16 %v3009_v24 }
 0x3b3   : > { %v3031_v57 = vunpack.i.h.bf16 %v3029_v25  ;;  %v3030_v19 = vunpack.i.l.bf16 %v3029_v25 }
 0x3b4   : > { %v2122_v59 = vsel %vm936_vm6, %v2114_v39, %v3011_v30  ;;  %v2121_v16 = vsel %vm936_vm6, %v2113_v1, %v3010_v36 }
 0x3b5   : > { %v3014_v47 = vpop.permute.xlu0 %3013  ;;  %v2115_v12 = vsel %vm1511_vm7, %v2107_v4, %v3030_v19  ;;  %v2116_v8 = vsel %vm1511_vm7, %v2108_v43, %v3031_v57 }
 0x3b6   : > { %v3039_v33 = vpop.permute.xlu1 %3038  ;;  %v3016_v41 = vunpack.i.h.bf16 %v3014_v47  ;;  %v3015_v31 = vunpack.i.l.bf16 %v3014_v47 }
 0x3b7   : > { %v3041_v52 = vunpack.i.h.bf16 %v3039_v33  ;;  %v3040_v34 = vunpack.i.l.bf16 %v3039_v33 }
 0x3b8   : > { %v2129_v40 = vsel %vm1528_vm8, %v2121_v16, %v3015_v31  ;;  %v2130_v37 = vsel %vm1528_vm8, %v2122_v59, %v3016_v41 }
 0x3b9   : > { %v3019_v13 = vpop.permute.xlu0 %3018  ;;  %v2124_v6 = vsel %vm936_vm6, %v2116_v8, %v3041_v52  ;;  %v2123_v9 = vsel %vm936_vm6, %v2115_v12, %v3040_v34 }
 0x3ba   : > { %v3044_v28 = vpop.permute.xlu1 %3043  ;;  %v3021_v21 = vunpack.i.h.bf16 %v3019_v13  ;;  %v3020_v26 = vunpack.i.l.bf16 %v3019_v13 }
 0x3bb   : > { %v3046_v44 = vunpack.i.h.bf16 %v3044_v28  ;;  %v3045_v32 = vunpack.i.l.bf16 %v3044_v28 }
 0x3bc   : > { %v2137_v2 = vsel %vm1537_vm9, %v2129_v40, %v3020_v26  ;;  %v2138_v7 = vsel %vm1537_vm9, %v2130_v37, %v3021_v21 }
 0x3bd   : > { %v3034_v42 = vpop.permute.xlu0 %3033  ;;  %v2131_v14 = vsel %vm1528_vm8, %v2123_v9, %v3045_v32  ;;  %v2132_v15 = vsel %vm1528_vm8, %v2124_v6, %v3046_v44 }
 0x3be   : > { %v3049_v46 = vpop.permute.xlu1 %3048  ;;  %v3036_v48 = vunpack.i.h.bf16 %v3034_v42  ;;  %v3035_v49 = vunpack.i.l.bf16 %v3034_v42 }
 0x3bf   : > { %v3051_v51 = vunpack.i.h.bf16 %v3049_v46  ;;  %v3050_v56 = vunpack.i.l.bf16 %v3049_v46 }
 0x3c0   : > { %v2146_v45 = vsel %vm972_vm10, %v2138_v7, %v3036_v48  ;;  %v2145_v27 = vsel %vm972_vm10, %v2137_v2, %v3035_v49 }
 0x3c1   : > { %v3059_v58 = vpop.permute.xlu0 %3058  ;;  %v2139_v60 = vsel %vm1537_vm9, %v2131_v14, %v3050_v56  ;;  %v2140_v3 = vsel %vm1537_vm9, %v2132_v15, %v3051_v51 }
 0x3c2   : > { %v3061_v55 = vunpack.i.h.bf16 %v3059_v58  ;;  %v3060_v54 = vunpack.i.l.bf16 %v3059_v58  ;;  %v3054_v35 = vpop.permute.xlu1 %3053 }
 0x3c3   : > { %v3056_v20 = vunpack.i.h.bf16 %v3054_v35  ;;  %v3055_v61 = vunpack.i.l.bf16 %v3054_v35 }
 0x3c4   : > { %v2153_v0 = vsel %vm1554_vm11, %v2145_v27, %v3060_v54  ;;  %v2154_v5 = vsel %vm1554_vm11, %v2146_v45, %v3061_v55 }
 0x3c5   : > { %v2161_v11 = vpack.c.bf16 %v2154_v5, %v2153_v0  ;;  %v2147_v24 = vsel %vm972_vm10, %v2139_v60, %v3055_v61  ;;  %v2148_v25 = vsel %vm972_vm10, %v2140_v3, %v3056_v20 }
 0x3c6   : > { %v3064_v18 = vpop.permute.xlu1 %3063 }
 0x3c7   : > { %v3066_v23 = vunpack.i.h.bf16 %v3064_v18  ;;  %v3065_v53 = vunpack.i.l.bf16 %v3064_v18  ;;  %2298 = vmatmul.mubr.bf16.gmra.mrb[16].mxu0 %v2161_v11 }
 0x3c9   : > { %v2155_v47 = vsel %vm1554_vm11, %v2147_v24, %v3065_v53  ;;  %v2156_v33 = vsel %vm1554_vm11, %v2148_v25, %v3066_v23 }
 0x3ca   : > { %v2163_v29 = vpack.c.bf16 %v2156_v33, %v2155_v47 }
 0x3cc   : > { %2306 = vmatmul.mubr.bf16.vlgmr.msra.gmra.mrb[16].mxu1 %v2163_v29 }
 0x46e   : > { %v2283_v62 = vpop.f32.mrb[8].mxu0 }
 0x46f   : > { %v2321_v13 = vmul.f32 %v2546_v63, %v2283_v62  ;;  %v2285_v22 = vpop.f32.mrb[9].mxu0 }
 0x470   : > { %v2286_v50 = vpop.f32.mrb[10].mxu0 }
 0x471   : > { %v2336_v28 = vadd.f32 %v3924_v10, %v2321_v13  ;;  %v2322_v30 = vmul.f32 %v2546_v63, %v2286_v50  ;;  %v2288_v36 = vpop.f32.mrb[11].mxu0 }
 0x473   : > { %vm2344_vm0 = vcmp.ge.f32.partialorder %v2336_v28, 0.0  ;;  %v2352_v17 = vmul.f32 0.2, %v2336_v28  ;;  %v2337_v38 = vadd.f32 %v3924_v10, %v2322_v30 }
 0x475   : > { %v2360_v57 = vsel %vm2344_vm0, %v2336_v28, %v2352_v17  ;;  %vm2345_vm6 = vcmp.ge.f32.partialorder %v2337_v38, 0.0  ;;  %v2353_v19 = vmul.f32 0.2, %v2337_v38 }
 0x476   : > { %v2368_v1 = vmul.f32 1.4142135, %v2360_v57 }
 0x477   : > { %v2361_v39 = vsel %vm2345_vm6, %v2337_v38, %v2353_v19 }
 0x478   : > { %2376 = vst.msk [vmem:[%s3933_s15] sm:$0xff] %vm572_vm2, %v2368_v1  ;;  %v2369_v41 = vmul.f32 1.4142135, %v2361_v39 }
 0x47a   : > { %2377 = vst.msk [vmem:[%s3933_s15 + $0x8] sm:$0xff] %vm572_vm2, %v2369_v41 }
 0x47f   : > { %v2291_v31 = vpop.f32.mrb[12].mxu0 }
 0x480   : > { %v2323_v42 = vmul.f32 %v2546_v63, %v2291_v31  ;;  %v2293_v4 = vpop.f32.mrb[13].mxu0 }
 0x481   : > { %v2294_v43 = vpop.f32.mrb[14].mxu0 }
 0x482   : > { %v2338_v21 = vadd.f32 %v3924_v10, %v2323_v42  ;;  %v2324_v26 = vmul.f32 %v2546_v63, %v2294_v43  ;;  %v2296_v46 = vpop.f32.mrb[15].mxu0 }
 0x484   : > { %vm2346_vm10 = vcmp.ge.f32.partialorder %v2338_v21, 0.0  ;;  %v2354_v59 = vmul.f32 0.2, %v2338_v21  ;;  %v2339_v16 = vadd.f32 %v3924_v10, %v2324_v26 }
 0x486   : > { %v2362_v48 = vsel %vm2346_vm10, %v2338_v21, %v2354_v59  ;;  %vm2347_vm7 = vcmp.ge.f32.partialorder %v2339_v16, 0.0  ;;  %v2355_v49 = vmul.f32 0.2, %v2339_v16 }
 0x487   : > { %v2370_v12 = vmul.f32 1.4142135, %v2362_v48 }
 0x488   : > { %v2363_v8 = vsel %vm2347_vm7, %v2339_v16, %v2355_v49 }
 0x489   : > { %2378 = vst.msk [vmem:[%s3933_s15 + $0x10] sm:$0xff] %vm572_vm2, %v2370_v12  ;;  %v2371_v52 = vmul.f32 1.4142135, %v2363_v8 }
 0x48b   : > { %2379 = vst.msk [vmem:[%s3933_s15 + $0x18] sm:$0xff] %vm572_vm2, %v2371_v52 }
 0x49a   : > { %v2299_v34 = vpop.f32.mrb[16].mxu0 }
 0x49b   : > { %v2325_v40 = vmul.f32 %v2546_v63, %v2299_v34  ;;  %v2301_v37 = vpop.f32.mrb[17].mxu0 }
 0x49c   : > { %v2302_v44 = vpop.f32.mrb[18].mxu0 }
 0x49d   : > { %v2340_v32 = vadd.f32 %v3924_v10, %v2325_v40  ;;  %v2326_v58 = vmul.f32 %v2546_v63, %v2302_v44  ;;  %v2304_v2 = vpop.f32.mrb[19].mxu0 }
 0x49f   : > { %vm2348_vm8 = vcmp.ge.f32.partialorder %v2340_v32, 0.0  ;;  %v2356_v7 = vmul.f32 0.2, %v2340_v32  ;;  %v2341_v55 = vadd.f32 %v3924_v10, %v2326_v58  ;;  %v2307_v54 = vpop.f32.mrb[16].mxu1 }
 0x4a0   : > { %v2327_v35 = vmul.f32 %v2546_v63, %v2307_v54  ;;  %v2309_v45 = vpop.f32.mrb[17].mxu1 }
 0x4a1   : > { %v2364_v27 = vsel %vm2348_vm8, %v2340_v32, %v2356_v7  ;;  %vm2349_vm9 = vcmp.ge.f32.partialorder %v2341_v55, 0.0  ;;  %v2357_v51 = vmul.f32 0.2, %v2341_v55  ;;  %v2310_v56 = vpop.f32.mrb[18].mxu1 }
 0x4a2   : > { %v2372_v20 = vmul.f32 1.4142135, %v2364_v27  ;;  %v2342_v61 = vadd.f32 %v3924_v10, %v2327_v35  ;;  %v2328_v0 = vmul.f32 %v2546_v63, %v2310_v56  ;;  %v2312_v5 = vpop.f32.mrb[19].mxu1 }
 0x4a3   : > { %v2365_v6 = vsel %vm2349_vm9, %v2341_v55, %v2357_v51 }
 0x4a4   : > { %2380 = vst.msk [vmem:[%s3933_s15 + $0x20] sm:$0xff] %vm572_vm2, %v2372_v20  ;;  %v2373_v9 = vmul.f32 1.4142135, %v2365_v6  ;;  %vm2350_vm11 = vcmp.ge.f32.partialorder %v2342_v61, 0.0  ;;  %v2358_v11 = vmul.f32 0.2, %v2342_v61  ;;  %v2343_v14 = vadd.f32 %v3924_v10, %v2328_v0 }
 0x4a6   : > { %2381 = vst.msk [vmem:[%s3933_s15 + $0x28] sm:$0xff] %vm572_vm2, %v2373_v9  ;;  %v2366_v15 = vsel %vm2350_vm11, %v2342_v61, %v2358_v11  ;;  %vm2351_vm12 = vcmp.ge.f32.partialorder %v2343_v14, 0.0  ;;  %v2359_v18 = vmul.f32 0.2, %v2343_v14 }
 0x4a7   : > { %v2374_v60 = vmul.f32 1.4142135, %v2366_v15 }
 0x4a8   : > { %v2367_v3 = vsel %vm2351_vm12, %v2343_v14, %v2359_v18 }
 0x4a9   : > { %2382 = vst.msk [vmem:[%s3933_s15 + $0x30] sm:$0xff] %vm572_vm2, %v2374_v60  ;;  %v2375_v23 = vmul.f32 1.4142135, %v2367_v3 }
 0x4ab   : > { %2383 = vst.msk [vmem:[%s3933_s15 + $0x38] sm:$0xff] %vm572_vm2, %v2375_v23 }
 0x4ac PF: > { %s23_s25 = sadd.s32 1, %s3098_s25  }
 0x4ad   : > { %p20_p4 = scmp.ge.s32.totalorder %s23_s25, 4  }
 0x4af   :  { %22 = sbr.rel (!%p20_p4) target bundleno = 1 (0x1), region = 122 }

</bundles_post_ra>
